<compile_context>
chip_gen: v6e
topology: v6e:2x2x1
jax: 0.10.0
libtpu: 0.0.40
codegen_flags: <defaults>
</compile_context>

<pallas_src>
import functools

import jax
import jax.numpy as jnp
import numpy as np
from jax.experimental import pallas as pl
from jax.experimental.pallas import tpu as pltpu


def _pick_row_block(H, max_rows=128):
    """Largest divisor of H that is <= min(max_rows, H//2) (>=2 row blocks when possible)."""
    cap = min(max_rows, max(H // 2, 1))
    for cand in range(cap, 0, -1):
        if H % cand == 0:
            return cand
    return H


def _conv_ps_prelu_kernel(x_ref, w_ref, b_ref, a_ref, o_ref, xpad_ref, *,
                          rows, W, C, r):
    """One (batch, row-block) step: 3x3 conv + bias + PReLU + fused pixel shuffle.

    x_ref   : (1, H, W, C)        full NHWC image (resident across row blocks)
    w_ref   : (9*C, OC)           im2col weights, rows=(dh,dw,cin), cols=(i,j,c)
    b_ref   : (1, OC)             bias, permuted to (i,j,c) order
    a_ref   : (1, OC)             PReLU slope alpha[c] broadcast to (i,j,c) order
    o_ref   : (1, rows, r*W*r*C)  shuffled, channels-last output row block
    xpad_ref: VMEM (rows+2, W+2, C) scratch holding the haloed input row block
    """
    rC = r * C
    rb = pl.program_id(1)
    nrb = pl.num_programs(1)
    row0 = rb * rows

    # ---- build the haloed row block in VMEM (replaces the jnp.pad HBM pass) ----
    xpad_ref[...] = jnp.zeros_like(xpad_ref)                       # zero halo (tiny)
    xpad_ref[1:rows + 1, 1:W + 1, :] = x_ref[0, pl.ds(row0, rows)]

    @pl.when(rb > 0)
    def _():                                                       # top neighbour row
        xpad_ref[0:1, 1:W + 1, :] = x_ref[0, pl.ds(row0 - 1, 1)]

    @pl.when(rb < nrb - 1)
    def _():                                                       # bottom neighbour row
        xpad_ref[rows + 1:rows + 2, 1:W + 1, :] = x_ref[0, pl.ds(row0 + rows, 1)]

    # ---- 3 dw-shifted views built once (3 sublane relayouts, not 9) ----
    xp = xpad_ref[...]                                             # (rows+2, W+2, C)
    xs = [xp[:, dw:dw + W, :] for dw in range(3)]                  # each (rows+2, W, C)

    # ---- im2col: one MXU contraction with K = 9*C ----
    cols = [xs[dw][dh:dh + rows] for dh in range(3) for dw in range(3)]
    patches = jnp.concatenate(cols, axis=-1)                       # (rows, W, 9C)
    y = jax.lax.dot_general(
        patches, w_ref[...],
        dimension_numbers=(((2,), (0,)), ((), ())),
        preferred_element_type=jnp.float32)                        # (rows, W, OC)

    # ---- bias + PReLU (pre-shuffle with per-(i,j,c) alpha == post-shuffle PReLU) ----
    y = y + b_ref[0][None, None, :]
    alpha = a_ref[0][None, None, :]
    y = jnp.where(y > 0, y, alpha * y)

    # ---- fused pixel shuffle: pack to lane-dense (rows, r*W*r*C) slab ----
    # column m of y is (i, j, c); output flat order per input row h is (i, w, j, c).
    parts = [y[:, :, i * rC:(i + 1) * rC].reshape(rows, W * rC) for i in range(r)]
    o_ref[0] = jnp.concatenate(parts, axis=-1).astype(o_ref.dtype)


def upsample_block(x_nchw, weight_oihw, bias, alpha, scale_factor, *, max_rows=128):
    """Forward pass of UpsampleBlock. x_nchw: (N, C, H, W) float32 -> (N, C, H*r, W*r)."""
    N, C, H, W = x_nchw.shape
    r = int(scale_factor)
    OC = C * r * r
    assert weight_oihw.shape == (OC, C, 3, 3)

    rows = _pick_row_block(H, max_rows)
    nrb = H // rows

    # --- glue (input-sized / tiny tensors only; the r^2-larger output gets no extra pass) ---
    # NCHW -> NHWC for channels-last matmul; drop this if the surrounding model is NHWC.
    x_nhwc = jnp.transpose(x_nchw, (0, 2, 3, 1))                   # (N, H, W, C)
    # Weights (OC, Cin, 3, 3) with oc = c*r^2 + i*r + j  ->  (9*Cin, OC') where
    # rows = (dh, dw, cin) matches the kernel's im2col order and columns are
    # permuted to (i, j, c) so the matmul output is already in pixel-shuffle order.
    w_mat = (weight_oihw.reshape(C, r, r, C, 3, 3)
             .transpose(4, 5, 3, 1, 2, 0)
             .reshape(9 * C, OC)).astype(jnp.float32)
    b_perm = bias.reshape(C, r, r).transpose(1, 2, 0).reshape(1, OC).astype(jnp.float32)
    a_perm = jnp.tile(alpha, (r * r,)).reshape(1, OC).astype(jnp.float32)

    kernel = functools.partial(_conv_ps_prelu_kernel, rows=rows, W=W, C=C, r=r)

    y = pl.pallas_call(
        kernel,
        out_shape=jax.ShapeDtypeStruct((N, H, W * OC), jnp.float32),
        grid_spec=pltpu.PrefetchScalarGridSpec(
            num_scalar_prefetch=0,
            grid=(N, nrb),
            in_specs=[
                # Full image resident per batch element (re-DMA'd only when n changes);
                # the kernel slices the row block + halo out of it.
                pl.BlockSpec((1, H, W, C), lambda n, rb: (n, 0, 0, 0)),
                pl.BlockSpec((9 * C, OC), lambda n, rb: (0, 0)),
                pl.BlockSpec((1, OC), lambda n, rb: (0, 0)),
                pl.BlockSpec((1, OC), lambda n, rb: (0, 0)),
            ],
            out_specs=pl.BlockSpec((1, rows, W * OC), lambda n, rb: (n, rb, 0)),
            scratch_shapes=[pltpu.VMEM((rows + 2, W + 2, C), jnp.float32)],
        ),
        compiler_params=pltpu.CompilerParams(
            dimension_semantics=("parallel", "parallel"),
            vmem_limit_bytes=64 * 1024 * 1024,
        ),
    )(x_nhwc, w_mat, b_perm, a_perm)

    # Kernel already wrote the pixel-shuffled (h, i, w, j, c) order -> free reshape.
    y = y.reshape(N, H * r, W * r, C)
    # Final NHWC -> NCHW transpose only because the module API is NCHW.
    return jnp.transpose(y, (0, 3, 1, 2))


def _reference_forward(x_nchw, weight_oihw, bias, alpha, scale_factor):
    """Pure-JAX reference (lax conv) mirroring the PyTorch module exactly."""
    r = scale_factor
    y = jax.lax.conv_general_dilated(
        x_nchw, weight_oihw, window_strides=(1, 1),
        padding=((1, 1), (1, 1)),
        dimension_numbers=("NCHW", "OIHW", "NCHW"))
    y = y + bias[None, :, None, None]
    N, OC, H, W = y.shape
    C = OC // (r * r)
    y = (y.reshape(N, C, r, r, H, W)
          .transpose(0, 1, 4, 2, 5, 3)
          .reshape(N, C, H * r, W * r))
    return jnp.where(y > 0, y, alpha[None, :, None, None] * y)


if __name__ == "__main__":
    # Small shapes consistent with the module: batch=2, in_c=4, spatial=16, scale=2.
    N, C, H, W = 2, 4, 16, 16
    scale = 2
    OC = C * scale * scale

    key = jax.random.PRNGKey(0)
    kx, kw, kb = jax.random.split(key, 3)
    x = jax.random.normal(kx, (N, C, H, W), dtype=jnp.float32)
    weight = jax.random.normal(kw, (OC, C, 3, 3), dtype=jnp.float32) * 0.1
    bias = jax.random.normal(kb, (OC,), dtype=jnp.float32) * 0.1
    alpha = jnp.full((C,), 0.25, dtype=jnp.float32)   # PReLU default init

    out = upsample_block(x, weight, bias, alpha, scale)
    out = jax.block_until_ready(out)

    ref = _reference_forward(x, weight, bias, alpha, scale)
    assert out.shape == (N, C, H * scale, W * scale), out.shape
    np.testing.assert_allclose(np.asarray(out), np.asarray(ref),
                               rtol=1e-4, atol=1e-4)
    print("KERNEL_OK")
</pallas_src>

<mosaic_0001>
module attributes {stable_mosaic.version = 11 : i64} {
  func.func @_conv_ps_prelu_kernel(%arg0: i32, %arg1: i32, %arg2: memref<1x16x16x4xf32, #tpu.memory_space<vmem>>, %arg3: memref<36x16xf32, #tpu.memory_space<vmem>>, %arg4: memref<1x16xf32, #tpu.memory_space<vmem>>, %arg5: memref<1x16xf32, #tpu.memory_space<vmem>>, %arg6: memref<1x8x256xf32, #tpu.memory_space<vmem>>, %arg7: memref<10x18x4xf32, #tpu.memory_space<vmem>>) attributes {dimension_semantics = [#tpu.dimension_semantics<parallel>, #tpu.dimension_semantics<parallel>], iteration_bounds = array<i64: 2, 2>, scalar_prefetch = 0 : i64, scratch_operands = 1 : i64, tpu.core_type = #tpu.core_type<tc>, window_params = [{transform_indices = @transform_0, window_bounds = array<i64: 1, 16, 16, 4>}, {pipeline_mode = #tpu.pipeline_mode<synchronous>, transform_indices = @transform_1, window_bounds = array<i64: 36, 16>}, {pipeline_mode = #tpu.pipeline_mode<synchronous>, transform_indices = @transform_2, window_bounds = array<i64: 1, 16>}, {pipeline_mode = #tpu.pipeline_mode<synchronous>, transform_indices = @transform_3, window_bounds = array<i64: 1, 16>}, {transform_indices = @transform_4, window_bounds = array<i64: 1, 8, 256>}]} {
    %c8_i32 = arith.constant 8 : i32
    %0 = arith.muli %arg1, %c8_i32 : i32
    %cst = arith.constant 0.000000e+00 : f32
    %1 = vector.broadcast %cst : f32 to vector<10x18x4xf32>
    %c0 = arith.constant 0 : index
    %c0_0 = arith.constant 0 : index
    %c0_1 = arith.constant 0 : index
    %2 = vector.load %arg7[%c0, %c0_0, %c0_1] : memref<10x18x4xf32, #tpu.memory_space<vmem>>, vector<10x18x4xf32>
    tpu.vector_store %arg7[%c0, %c0_0, %c0_1], %1 {strides = array<i32>} : memref<10x18x4xf32, #tpu.memory_space<vmem>>, vector<10x18x4xf32>,
    %c0_2 = arith.constant 0 : index
    %3 = arith.index_cast %0 : i32 to index
    %c0_3 = arith.constant 0 : index
    %c0_4 = arith.constant 0 : index
    %4 = vector.load %arg2[%c0_2, %3, %c0_3, %c0_4] : memref<1x16x16x4xf32, #tpu.memory_space<vmem>>, vector<1x8x16x4xf32>
    %5 = vector.shape_cast %4 : vector<1x8x16x4xf32> to vector<8x16x4xf32>
    %c1 = arith.constant 1 : index
    %c1_5 = arith.constant 1 : index
    %c0_6 = arith.constant 0 : index
    %6 = vector.load %arg7[%c1, %c1_5, %c0_6] : memref<10x18x4xf32, #tpu.memory_space<vmem>>, vector<8x16x4xf32>
    tpu.vector_store %arg7[%c1, %c1_5, %c0_6], %5 {strides = array<i32>} : memref<10x18x4xf32, #tpu.memory_space<vmem>>, vector<8x16x4xf32>,
    %c0_i32 = arith.constant 0 : i32
    %7 = arith.cmpi sgt, %arg1, %c0_i32 : i32
    %8 = arith.extui %7 : i1 to i32
    %c0_i32_7 = arith.constant 0 : i32
    %9 = arith.cmpi ne, %8, %c0_i32_7 : i32
    scf.if %9 {
      %c1_i32_23 = arith.constant 1 : i32
      %50 = arith.subi %0, %c1_i32_23 : i32
      %c0_24 = arith.constant 0 : index
      %51 = arith.index_cast %50 : i32 to index
      %c0_25 = arith.constant 0 : index
      %c0_26 = arith.constant 0 : index
      %52 = vector.load %arg2[%c0_24, %51, %c0_25, %c0_26] : memref<1x16x16x4xf32, #tpu.memory_space<vmem>>, vector<1x1x16x4xf32>
      %53 = vector.shape_cast %52 : vector<1x1x16x4xf32> to vector<1x16x4xf32>
      %c0_27 = arith.constant 0 : index
      %c1_28 = arith.constant 1 : index
      %c0_29 = arith.constant 0 : index
      %54 = vector.load %arg7[%c0_27, %c1_28, %c0_29] : memref<10x18x4xf32, #tpu.memory_space<vmem>>, vector<1x16x4xf32>
      tpu.vector_store %arg7[%c0_27, %c1_28, %c0_29], %53 {strides = array<i32>} : memref<10x18x4xf32, #tpu.memory_space<vmem>>, vector<1x16x4xf32>,
    } else {
    }
    %c1_i32 = arith.constant 1 : i32
    %10 = arith.cmpi slt, %arg1, %c1_i32 : i32
    %11 = arith.extui %10 : i1 to i32
    %c0_i32_8 = arith.constant 0 : i32
    %12 = arith.cmpi ne, %11, %c0_i32_8 : i32
    scf.if %12 {
      %c8_i32_23 = arith.constant 8 : i32
      %50 = arith.addi %0, %c8_i32_23 : i32
      %c0_24 = arith.constant 0 : index
      %51 = arith.index_cast %50 : i32 to index
      %c0_25 = arith.constant 0 : index
      %c0_26 = arith.constant 0 : index
      %52 = vector.load %arg2[%c0_24, %51, %c0_25, %c0_26] : memref<1x16x16x4xf32, #tpu.memory_space<vmem>>, vector<1x1x16x4xf32>
      %53 = vector.shape_cast %52 : vector<1x1x16x4xf32> to vector<1x16x4xf32>
      %c9 = arith.constant 9 : index
      %c1_27 = arith.constant 1 : index
      %c0_28 = arith.constant 0 : index
      %54 = vector.load %arg7[%c9, %c1_27, %c0_28] : memref<10x18x4xf32, #tpu.memory_space<vmem>>, vector<1x16x4xf32>
      tpu.vector_store %arg7[%c9, %c1_27, %c0_28], %53 {strides = array<i32>} : memref<10x18x4xf32, #tpu.memory_space<vmem>>, vector<1x16x4xf32>,
    } else {
    }
    %c0_9 = arith.constant 0 : index
    %c0_10 = arith.constant 0 : index
    %c0_11 = arith.constant 0 : index
    %13 = vector.load %arg7[%c0_9, %c0_10, %c0_11] : memref<10x18x4xf32, #tpu.memory_space<vmem>>, vector<10x18x4xf32>
    %14 = vector.extract_strided_slice %13 {offsets = [0, 0, 0], sizes = [10, 16, 4], strides = [1, 1, 1]} : vector<10x18x4xf32> to vector<10x16x4xf32>
    %15 = vector.extract_strided_slice %13 {offsets = [0, 1, 0], sizes = [10, 16, 4], strides = [1, 1, 1]} : vector<10x18x4xf32> to vector<10x16x4xf32>
    %16 = vector.extract_strided_slice %13 {offsets = [0, 2, 0], sizes = [10, 16, 4], strides = [1, 1, 1]} : vector<10x18x4xf32> to vector<10x16x4xf32>
    %17 = vector.extract_strided_slice %14 {offsets = [0, 0, 0], sizes = [8, 16, 4], strides = [1, 1, 1]} : vector<10x16x4xf32> to vector<8x16x4xf32>
    %18 = vector.extract_strided_slice %15 {offsets = [0, 0, 0], sizes = [8, 16, 4], strides = [1, 1, 1]} : vector<10x16x4xf32> to vector<8x16x4xf32>
    %19 = vector.extract_strided_slice %16 {offsets = [0, 0, 0], sizes = [8, 16, 4], strides = [1, 1, 1]} : vector<10x16x4xf32> to vector<8x16x4xf32>
    %20 = vector.extract_strided_slice %14 {offsets = [1, 0, 0], sizes = [8, 16, 4], strides = [1, 1, 1]} : vector<10x16x4xf32> to vector<8x16x4xf32>
    %21 = vector.extract_strided_slice %15 {offsets = [1, 0, 0], sizes = [8, 16, 4], strides = [1, 1, 1]} : vector<10x16x4xf32> to vector<8x16x4xf32>
    %22 = vector.extract_strided_slice %16 {offsets = [1, 0, 0], sizes = [8, 16, 4], strides = [1, 1, 1]} : vector<10x16x4xf32> to vector<8x16x4xf32>
    %23 = vector.extract_strided_slice %14 {offsets = [2, 0, 0], sizes = [8, 16, 4], strides = [1, 1, 1]} : vector<10x16x4xf32> to vector<8x16x4xf32>
    %24 = vector.extract_strided_slice %15 {offsets = [2, 0, 0], sizes = [8, 16, 4], strides = [1, 1, 1]} : vector<10x16x4xf32> to vector<8x16x4xf32>
    %25 = vector.extract_strided_slice %16 {offsets = [2, 0, 0], sizes = [8, 16, 4], strides = [1, 1, 1]} : vector<10x16x4xf32> to vector<8x16x4xf32>
    %26 = tpu.concatenate %17, %18, %19, %20, %21, %22, %23, %24, %25 in 2 : vector<8x16x4xf32>, vector<8x16x4xf32>, vector<8x16x4xf32>, vector<8x16x4xf32>, vector<8x16x4xf32>, vector<8x16x4xf32>, vector<8x16x4xf32>, vector<8x16x4xf32>, vector<8x16x4xf32> -> vector<8x16x36xf32>
    %c0_12 = arith.constant 0 : index
    %c0_13 = arith.constant 0 : index
    %27 = vector.load %arg3[%c0_12, %c0_13] : memref<36x16xf32, #tpu.memory_space<vmem>>, vector<36x16xf32>
    %cst_14 = arith.constant dense<0.000000e+00> : vector<8x16x16xf32>
    %28 = tpu.matmul %26, %27, %cst_14 {dimension_numbers = #tpu.dot_dimension_numbers<[2], [0], [0, 1], [1], [0, 0, 0, 1, 1, 1], [], []>} : vector<8x16x36xf32>, vector<36x16xf32>, vector<8x16x16xf32> -> vector<8x16x16xf32>
    %c0_15 = arith.constant 0 : index
    %c0_16 = arith.constant 0 : index
    %29 = vector.load %arg4[%c0_15, %c0_16] : memref<1x16xf32, #tpu.memory_space<vmem>>, vector<1x16xf32>
    %30 = vector.shape_cast %29 : vector<1x16xf32> to vector<16xf32>
    %31 = vector.shape_cast %30 : vector<16xf32> to vector<1x1x16xf32>
    %32 = vector.broadcast %31 : vector<1x1x16xf32> to vector<8x16x16xf32>
    %33 = arith.addf %28, %32 : vector<8x16x16xf32>
    %c0_17 = arith.constant 0 : index
    %c0_18 = arith.constant 0 : index
    %34 = vector.load %arg5[%c0_17, %c0_18] : memref<1x16xf32, #tpu.memory_space<vmem>>, vector<1x16xf32>
    %35 = vector.shape_cast %34 : vector<1x16xf32> to vector<16xf32>
    %36 = vector.shape_cast %35 : vector<16xf32> to vector<1x1x16xf32>
    %cst_19 = arith.constant 0.000000e+00 : f32
    %37 = vector.broadcast %cst_19 : f32 to vector<8x16x16xf32>
    %38 = arith.cmpf ogt, %33, %37 : vector<8x16x16xf32>
    %39 = vector.broadcast %36 : vector<1x1x16xf32> to vector<8x16x16xf32>
    %40 = arith.mulf %39, %33 : vector<8x16x16xf32>
    %41 = arith.select %38, %33, %40 : vector<8x16x16xi1>, vector<8x16x16xf32>
    %42 = vector.extract_strided_slice %41 {offsets = [0, 0, 0], sizes = [8, 16, 8], strides = [1, 1, 1]} : vector<8x16x16xf32> to vector<8x16x8xf32>
    %43 = vector.shape_cast %42 : vector<8x16x8xf32> to vector<8x128xf32>
    %44 = vector.extract_strided_slice %41 {offsets = [0, 0, 8], sizes = [8, 16, 8], strides = [1, 1, 1]} : vector<8x16x16xf32> to vector<8x16x8xf32>
    %45 = vector.shape_cast %44 : vector<8x16x8xf32> to vector<8x128xf32>
    %46 = tpu.concatenate %43, %45 in 1 : vector<8x128xf32>, vector<8x128xf32> -> vector<8x256xf32>
    %c0_20 = arith.constant 0 : index
    %c0_21 = arith.constant 0 : index
    %c0_22 = arith.constant 0 : index
    %47 = vector.load %arg6[%c0_20, %c0_21, %c0_22] : memref<1x8x256xf32, #tpu.memory_space<vmem>>, vector<1x8x256xf32>
    %48 = vector.shape_cast %47 : vector<1x8x256xf32> to vector<8x256xf32>
    %49 = vector.shape_cast %46 : vector<8x256xf32> to vector<1x8x256xf32>
    tpu.vector_store %arg6[%c0_20, %c0_21, %c0_22], %49 {strides = array<i32>} : memref<1x8x256xf32, #tpu.memory_space<vmem>>, vector<1x8x256xf32>,
    return
  }
  func.func @transform_0(%arg0: i32, %arg1: i32) -> (i32, i32, i32, i32) {
    %c0_i32 = arith.constant 0 : i32
    %c0_i32_0 = arith.constant 0 : i32
    %c0_i32_1 = arith.constant 0 : i32
    %c0_i32_2 = arith.constant 0 : i32
    return %arg0, %c0_i32, %c0_i32_0, %c0_i32_1 : i32, i32, i32, i32
  }
  func.func @transform_1(%arg0: i32, %arg1: i32) -> (i32, i32) {
    %c0_i32 = arith.constant 0 : i32
    %c0_i32_0 = arith.constant 0 : i32
    %c0_i32_1 = arith.constant 0 : i32
    return %c0_i32, %c0_i32_0 : i32, i32
  }
  func.func @transform_2(%arg0: i32, %arg1: i32) -> (i32, i32) {
    %c0_i32 = arith.constant 0 : i32
    %c0_i32_0 = arith.constant 0 : i32
    %c0_i32_1 = arith.constant 0 : i32
    return %c0_i32, %c0_i32_0 : i32, i32
  }
  func.func @transform_3(%arg0: i32, %arg1: i32) -> (i32, i32) {
    %c0_i32 = arith.constant 0 : i32
    %c0_i32_0 = arith.constant 0 : i32
    %c0_i32_1 = arith.constant 0 : i32
    return %c0_i32, %c0_i32_0 : i32, i32
  }
  func.func @transform_4(%arg0: i32, %arg1: i32) -> (i32, i32, i32) {
    %c0_i32 = arith.constant 0 : i32
    %c0_i32_0 = arith.constant 0 : i32
    return %arg0, %arg1, %c0_i32 : i32, i32, i32
  }
}

</mosaic_0001>

<bundles_post_ra>
// kernel: tpu_custom_call.1
= control target key start
LH: loop header
LB: loop body
LE: loop exit
PB: predicated region body
PF: predicated region fallthrough
CT: control target
= control target key end

     0   :  { %9 = vsyncpa [#allocation4], 0  ;;  %s3726_s0 = inlined_call_operand.vmem [shape: f32[2,16,16,4], index: 0, kind: input, shape index: {}]   ;;  %s3727_s1 = inlined_call_operand.vmem [shape: f32[36,16], index: 1, kind: input, shape index: {}]   ;;  %s3728_s2 = inlined_call_operand.vmem [shape: f32[1,16], index: 2, kind: input, shape index: {}]   ;;  %s3729_s3 = inlined_call_operand.vmem [shape: f32[1,16], index: 3, kind: input, shape index: {}]   ;;  %s3730_s4 = inlined_call_operand.hbm [shape: f32[2,16,256], index: 4, kind: output, shape index: {}]  }
   0x1   :  { %11 = vsyncpa [#allocation4 + $0x1], 0  ;;  %s2462_s15 = smov 0   ;;  %s2464_s16 = smov 0  }
   0x2   :  { %s2466_s17 = smov 0   ;;  %s2468_s18 = smov 0  }
   0x3   :  { %s2470_s19 = smov 0   ;;  %s2472_s20 = smov 0  }
   0x4   :  { %s2474_s21 = smov 0   ;;  %s2476_s22 = smov 0  }
   0x5 LB: > { %s2116_s23 = sadd.s32 4294967295, %s2412_s22   ;;  %s2117_s24 = sadd.s32 4294967294, %s2412_s22   ;;  %s2412_s22 = sphi %s2476_s22, %s17_s22   ;;  %s2408_s21 = sphi %s2474_s21, %s3778_s21   ;;  %s2404_s20 = sphi %s2472_s20, %s3777_s20   ;;  %s2400_s19 = sphi %s2470_s19, %s3776_s19   ;;  %s2396_s18 = sphi %s2468_s18, %s3775_s18   ;;  %s2392_s17 = sphi %s2466_s17, %s3774_s17   ;;  %s2388_s16 = sphi %s2464_s16, %s3773_s16   ;;  %s2384_s15 = sphi %s2462_s15, %s3772_s15  }
   0x6   : > { %s26_s25 = sadd.s32 1, %s2404_s20  ;;  %s29_s26 = sadd.s32 1, %s2408_s21 }
   0x7   : > { %p27_p0 = scmp.ge.s32.totalorder %s26_s25, 2  ;;  %p137_p1 = scmp.ne.s32.totalorder %s2392_s17, %s2388_s16 }
   0x8   : > { %p138_p2 = scmp.eq.s32.totalorder %s2116_s23, 3  ;;  %p143_p5 = scmp.ne.s32.totalorder %s2388_s16, %s2384_s15 }
   0x9   : > { %s3780_s25 = smov (%p27_p0, %s26_s25), 0  ;;  %s3782_s26 = smov (!%p27_p0, %s29_s26), %s2408_s21 }
   0xa   : > { %s123_s27 = ssub.s32 %s2404_s20, %s3780_s25  ;;  %p2513_p3 = por %p138_p2, %p137_p1 }
   0xb   : > { %p31_p4 = scmp.ge.s32.totalorder %s3782_s26, 2  ;;  %p144_p6 = scmp.eq.s32.totalorder %s2117_s24, 3 }
   0xc   : > { %p2120_p7 = scmp.ge.s32.totalorder %s2412_s22, 1  ;;  %p179_p9 = scmp.lt.s32.totalorder %s2412_s22, 5 }
   0xd   : > { %s3784_s26 = smov (%p31_p4, %s3782_s26), 0  ;;  %p2522_p8 = por %p144_p6, %p143_p5 }
   0xe   : > { %s122_s30 = ssub.s32 %s2408_s21, %s3784_s26  ;;  %s127_s5 = sadd.s32 1, %s2392_s17 }
   0xf   : > { %s124_s6 = sor.u32 %s123_s27, %s122_s30  ;;  %p180_p10 = pnand %p2120_p7, %p179_p9 }
  0x10   : > { %p125_p11 = scmp.eq.s32.totalorder %s124_s6, 0 }
  0x11   : > { %183 = sbr.rel (%p180_p10) target bundleno = 955 (0x3bb), region = 36 }
  0x12   : > { %s2531_s7 = scalar_select %p125_p11, %s2392_s17, %s127_s5  }
  0x16   : > { %vm211_vm0 = vcmask 31744   ;;  %vm214_vm1 = vcmask 25600   ;;  %s3731_s8 = sand.u32 1, %s2388_s16   ;;  %s2124_s9 = sshll.u32 %s2396_s18, 3  ;;  %v2414_v0 = vmov 0.0  }
  0x17   : > { %216 = vst.msk [vmem:[#allocation2 + $0x18] sm:$0xff] %vm211_vm0, %v2414_v0  ;;  %212 = vst.msk [vmem:[#allocation2] sm:$0xff] %vm211_vm0, %v2414_v0  ;;  %s2567_s10 = sshll.u32 %s3731_s8, 4  ;;  %p205_p12 = scmp.lt.s32.totalorder %s2400_s19, 1 }
  0x18   : > { %213 = vst.msk [vmem:[#allocation2 + $0x8] sm:$0xff] %vm211_vm0, %v2414_v0  ;;  %217 = vst.msk [vmem:[#allocation2 + $0x20] sm:$0xff] %vm211_vm0, %v2414_v0  ;;  %s2160_s12 = sshll.u32 %s2396_s18, 7  ;;  %s2613_s30 = scalar_lea.vmem [#allocation3], %s2567_s10 }
  0x19   : > { %219 = vst.msk [vmem:[#allocation2 + $0x30] sm:$0xff] %vm211_vm0, %v2414_v0  ;;  %220 = vst.msk [vmem:[#allocation2 + $0x38] sm:$0xff] %vm211_vm0, %v2414_v0  ;;  %s206_s11 = scalar_select %p205_p12, %s2400_s19, 1 }
  0x1a   : > { %222 = vst.msk [vmem:[#allocation2 + $0x48] sm:$0xff] %vm211_vm0, %v2414_v0  ;;  %223 = vst.msk [vmem:[#allocation2 + $0x50] sm:$0xff] %vm211_vm0, %v2414_v0  ;;  %p2126_p13 = scmp.le.s32.totalorder %s2396_s18, 0 }
  0x1b   : > { %225 = vst.msk [vmem:[#allocation2 + $0x60] sm:$0xff] %vm211_vm0, %v2414_v0  ;;  %226 = vst.msk [vmem:[#allocation2 + $0x68] sm:$0xff] %vm211_vm0, %v2414_v0  ;;  %s2159_s13 = sshll.u32 %s206_s11, 8  ;;  %s2127_s5 = sadd.s32 (!%p2126_p13), 4294967295, %s2124_s9 }
  0x1c   : > { %228 = vst.msk [vmem:[#allocation2 + $0x78] sm:$0xff] %vm211_vm0, %v2414_v0  ;;  %229 = vst.msk [vmem:[#allocation2 + $0x80] sm:$0xff] %vm211_vm0, %v2414_v0  ;;  %s2575_s24 = scalar_lea.vmem %s3726_s0, %s2159_s13  ;;  %s2128_s6 = sshll.u32 (!%p2126_p13), %s2127_s5, 4 }
  0x1d   : > { %231 = vst.msk [vmem:[#allocation2 + $0x90] sm:$0xff] %vm211_vm0, %v2414_v0  ;;  %232 = vst.msk [vmem:[#allocation2 + $0x98] sm:$0xff] %vm211_vm0, %v2414_v0  ;;  %s2578_s27 = scalar_lea.vmem %s2575_s24, %s2160_s12  ;;  %s284_s11 = scalar_lea.vmem (!%p2126_p13), %s2575_s24, %s2128_s6 }
  0x1e   : > { %234 = vst.msk [vmem:[#allocation2 + $0xa8] sm:$0xff] %vm211_vm0, %v2414_v0  ;;  %235 = vst.msk [vmem:[#allocation2 + $0xb0] sm:$0xff] %vm211_vm0, %v2414_v0  ;;  %v245_v1 = vld [vmem:[%s2578_s27] sm:$0xff]  ;;  %v246_v2 = vld [vmem:[%s2578_s27 + $0x8] sm:$0xff] }
  0x1f   : > { %237 = vst.msk [vmem:[#allocation2 + $0xc0] sm:$0xff] %vm211_vm0, %v2414_v0  ;;  %238 = vst.msk [vmem:[#allocation2 + $0xc8] sm:$0xff] %vm211_vm0, %v2414_v0  ;;  %v247_v3 = vld [vmem:[%s2578_s27 + $0x10] sm:$0xff]  ;;  %v248_v4 = vld [vmem:[%s2578_s27 + $0x18] sm:$0xff] }
  0x20   : > { %240 = vst.msk [vmem:[#allocation2 + $0xd8] sm:$0xff] %vm211_vm0, %v2414_v0  ;;  %241 = vst.msk [vmem:[#allocation2 + $0xe0] sm:$0xff] %vm211_vm0, %v2414_v0  ;;  %v249_v5 = vld [vmem:[%s2578_s27 + $0x20] sm:$0xff]  ;;  %v250_v6 = vld [vmem:[%s2578_s27 + $0x28] sm:$0xff] }
  0x21   : > { %218 = vst.msk [vmem:[#allocation2 + $0x28] sm:$0x3] %vm214_vm1, %v2414_v0  ;;  %215 = vst.msk [vmem:[#allocation2 + $0x10] sm:$0x3] %vm214_vm1, %v2414_v0  ;;  %v251_v7 = vld [vmem:[%s2578_s27 + $0x30] sm:$0xff]  ;;  %v252_v8 = vld [vmem:[%s2578_s27 + $0x38] sm:$0xff] }
  0x22   : > { %221 = vst.msk [vmem:[#allocation2 + $0x40] sm:$0x3] %vm214_vm1, %v2414_v0  ;;  %224 = vst.msk [vmem:[#allocation2 + $0x58] sm:$0x3] %vm214_vm1, %v2414_v0  ;;  %v253_v9 = vld [vmem:[%s2578_s27 + $0x40] sm:$0xff]  ;;  %v254_v10 = vld [vmem:[%s2578_s27 + $0x48] sm:$0xff] }
  0x23   : > { %227 = vst.msk [vmem:[#allocation2 + $0x70] sm:$0x3] %vm214_vm1, %v2414_v0  ;;  %230 = vst.msk [vmem:[#allocation2 + $0x88] sm:$0x3] %vm214_vm1, %v2414_v0  ;;  %v255_v11 = vld [vmem:[%s2578_s27 + $0x50] sm:$0xff]  ;;  %v256_v12 = vld [vmem:[%s2578_s27 + $0x58] sm:$0xff] }
  0x24   : > { %233 = vst.msk [vmem:[#allocation2 + $0xa0] sm:$0x3] %vm214_vm1, %v2414_v0  ;;  %236 = vst.msk [vmem:[#allocation2 + $0xb8] sm:$0x3] %vm214_vm1, %v2414_v0  ;;  %v257_v13 = vld [vmem:[%s2578_s27 + $0x60] sm:$0xff]  ;;  %v258_v14 = vld [vmem:[%s2578_s27 + $0x68] sm:$0xff] }
  0x25   : > { %239 = vst.msk [vmem:[#allocation2 + $0xd0] sm:$0x3] %vm214_vm1, %v2414_v0  ;;  %242 = vst.msk [vmem:[#allocation2 + $0xe8] sm:$0x3] %vm214_vm1, %v2414_v0  ;;  %v259_v15 = vld [vmem:[%s2578_s27 + $0x70] sm:$0xff]  ;;  %v260_v16 = vld [vmem:[%s2578_s27 + $0x78] sm:$0xff] }
  0x26   : > { %262 = vst.msk [vmem:[#allocation2 + $0x19] sm:$0xff] %vm211_vm0, %v245_v1  ;;  %263 = vst.msk [vmem:[#allocation2 + $0x21] sm:$0xff] %vm211_vm0, %v246_v2 }
  0x27   : > { %264 = vst.msk [vmem:[#allocation2 + $0x31] sm:$0xff] %vm211_vm0, %v247_v3  ;;  %265 = vst.msk [vmem:[#allocation2 + $0x39] sm:$0xff] %vm211_vm0, %v248_v4 }
  0x28   : > { %266 = vst.msk [vmem:[#allocation2 + $0x49] sm:$0xff] %vm211_vm0, %v249_v5  ;;  %267 = vst.msk [vmem:[#allocation2 + $0x51] sm:$0xff] %vm211_vm0, %v250_v6 }
  0x29   : > { %268 = vst.msk [vmem:[#allocation2 + $0x61] sm:$0xff] %vm211_vm0, %v251_v7  ;;  %269 = vst.msk [vmem:[#allocation2 + $0x69] sm:$0xff] %vm211_vm0, %v252_v8  ;;  %281 = sbr.rel (%p2126_p13) target bundleno = 48 (0x30), region = 40 }
  0x2a   : > { %270 = vst.msk [vmem:[#allocation2 + $0x79] sm:$0xff] %vm211_vm0, %v253_v9  ;;  %271 = vst.msk [vmem:[#allocation2 + $0x81] sm:$0xff] %vm211_vm0, %v254_v10 }
  0x2b   : > { %272 = vst.msk [vmem:[#allocation2 + $0x91] sm:$0xff] %vm211_vm0, %v255_v11  ;;  %273 = vst.msk [vmem:[#allocation2 + $0x99] sm:$0xff] %vm211_vm0, %v256_v12 }
  0x2c   : > { %274 = vst.msk [vmem:[#allocation2 + $0xa9] sm:$0xff] %vm211_vm0, %v257_v13  ;;  %275 = vst.msk [vmem:[#allocation2 + $0xb1] sm:$0xff] %vm211_vm0, %v258_v14 }
  0x2d   : > { %276 = vst.msk [vmem:[#allocation2 + $0xc1] sm:$0xff] %vm211_vm0, %v259_v15  ;;  %277 = vst.msk [vmem:[#allocation2 + $0xc9] sm:$0xff] %vm211_vm0, %v260_v16 }
  0x2e   : > { %v285_v17 = vld [vmem:[%s284_s11] sm:$0xff]  ;;  %v286_v18 = vld [vmem:[%s284_s11 + $0x8] sm:$0xff] }
  0x2f   : > { %287 = vst.msk [vmem:[#allocation2 + $0x1] sm:$0xff] %vm211_vm0, %v285_v17  ;;  %288 = vst.msk [vmem:[#allocation2 + $0x9] sm:$0xff] %vm211_vm0, %v286_v18 }
  0x30 PF: > { %p2129_p0 = scmp.ge.s32.totalorder %s2396_s18, 1 }
  0x32   : > { %292 = sbr.rel (%p2129_p0) target bundleno = 57 (0x39), region = 44 }
  0x37   : > { %v2132_v19 = vld [vmem:[%s2578_s27 + $0x80] sm:$0xff]  ;;  %v2133_v20 = vld [vmem:[%s2578_s27 + $0x88] sm:$0xff] }
  0x38   : > { %299 = vst.msk [vmem:[#allocation2 + $0xd9] sm:$0xff] %vm211_vm0, %v2132_v19  ;;  %300 = vst.msk [vmem:[#allocation2 + $0xe1] sm:$0xff] %vm211_vm0, %v2133_v20 }
  0x39 PF: > { %v2626_v21 = vld [vmem:[#allocation2 + $0x8] sm:$0xff]  ;;  %v303_v22 = vld [vmem:[#allocation2 + $0x10] sm:$0x3]  ;;  %vm355_vm2 = vcmask 1046528   ;;  %v2628_v23 = vld [vmem:[#allocation2] sm:$0xff]  ;;  %s2415_s9 = smov 4  }
  0x3a   : > { %v357_v24 = vrot.slane %v2626_v21, 1  ;;  %v359_v25 = vrot.slane %v303_v22, 1  ;;  %v356_v26 = vrot.slane %v2628_v23, 1  ;;  %v2632_v27 = vld [vmem:[#allocation2 + $0x68] sm:$0xff]  ;;  %v315_v28 = vld [vmem:[#allocation2 + $0x70] sm:$0x3] }
  0x3b   : > { %v377_v29 = vrot.slane %v2632_v27, 1  ;;  %v379_v30 = vrot.slane %v315_v28, 1  ;;  %v2635_v31 = vld [vmem:[#allocation2 + $0x60] sm:$0xff]  ;;  %v466_v36 = vrot.slane %v2632_v27, 2  ;;  %v445_v39 = vrot.slane %v2628_v23, 2  ;;  %s2416_s10 = smov 8  }
  0x3c   : > { %v360_v32 = vsel %vm355_vm2, %v357_v24, %v359_v25  ;;  %v358_v33 = vsel %vm355_vm2, %v356_v26, %v357_v24  ;;  %v376_v34 = vrot.slane %v2635_v31, 1  ;;  %v465_v35 = vrot.slane %v2635_v31, 2  ;;  %v2670_v47 = vld [vmem:[#allocation2 + $0x78] sm:$0xff]  ;;  %v2674_v49 = vld [vmem:[#allocation2 + $0x80] sm:$0xff]  ;;  %s2417_s12 = smov 12   ;;  %s3742_s13 = smov 16  }
  0x3d   : > { %398 = vrot.lane.b32.xlu1 %v360_v32, %s2415_s9  ;;  %396 = vrot.lane.b32.xlu0 %v358_v33, %s2415_s9  ;;  %v2645_v37 = vsel %vm355_vm2, %v377_v29, %v379_v30  ;;  %v446_v40 = vrot.slane %v2626_v21, 2  ;;  %vm444_vm3 = vcmask 1045504   ;;  %v468_v43 = vrot.slane %v315_v28, 2  ;;  %v2672_v48 = vld [vmem:[#allocation2 + $0x18] sm:$0xff]  ;;  %v2676_v50 = vld [vmem:[#allocation2 + $0x20] sm:$0xff]  ;;  %s2419_s14 = smov 20  }
  0x3e   : > { %v2648_v38 = vsel %vm355_vm2, %v376_v34, %v377_v29  ;;  %v2657_v41 = vsel %vm444_vm3, %v465_v35, %v466_v36  ;;  %v448_v44 = vrot.slane %v303_v22, 2  ;;  %v381_v51 = vrot.slane %v2670_v47, 1  ;;  %v318_v57 = vld [vmem:[#allocation2 + $0x88] sm:$0x3]  ;;  %v2731_v9 = vld [vmem:[#allocation2 + $0x90] sm:$0xff]  ;;  %s3744_s23 = smov 24  }
  0x3f   : > { %v447_v42 = vsel %vm444_vm3, %v445_v39, %v446_v40  ;;  %v2664_v45 = vsel %vm444_vm3, %v466_v36, %v468_v43  ;;  %v382_v52 = vrot.slane %v2674_v49, 1  ;;  %v361_v53 = vrot.slane %v2672_v48, 1  ;;  %v306_v58 = vld [vmem:[#allocation2 + $0x28] sm:$0x3]  ;;  %3747 = vst [vmem:[#allocation6_spill] sm:$0xff] %v2731_v9  ;;  %v2733_v10 = vld [vmem:[#allocation2 + $0x30] sm:$0xff] }
  0x40   : > { %v449_v46 = vsel %vm444_vm3, %v446_v40, %v448_v44  ;;  %v362_v54 = vrot.slane %v2676_v50, 1  ;;  %v384_v59 = vrot.slane %v318_v57, 1  ;;  %v364_v60 = vrot.slane %v306_v58, 1  ;;  %3748 = vst [vmem:[#allocation7_spill] sm:$0xff] %v2733_v10  ;;  %v2742_v11 = vld [vmem:[#allocation2 + $0x98] sm:$0xff]  ;;  %s3732_s24 = smov 28  }
  0x41   : > { %414 = vrot.lane.b32.xlu1 %v2645_v37, %s2415_s9  ;;  %412 = vrot.lane.b32.xlu0 %v2648_v38, %s2415_s9  ;;  %v2691_v55 = vsel %vm355_vm2, %v381_v51, %v382_v52  ;;  %v470_v61 = vrot.slane %v2670_v47, 2  ;;  %v471_v62 = vrot.slane %v2674_v49, 2  ;;  %v450_v1 = vrot.slane %v2672_v48, 2  ;;  %3749 = vst [vmem:[#allocation8_spill] sm:$0xff] %v2742_v11  ;;  %v2744_v12 = vld [vmem:[#allocation2 + $0x38] sm:$0xff]  ;;  %v984_v39 = vld [vmem:[%s3727_s1 + $0x10] sm:$0xff] }
  0x42   : > { %v363_v56 = vsel %vm355_vm2, %v361_v53, %v362_v54  ;;  %v2703_v63 = vsel %vm355_vm2, %v382_v52, %v384_v59  ;;  %v365_v0 = vsel %vm355_vm2, %v362_v54, %v364_v60  ;;  %v451_v2 = vrot.slane %v2676_v50, 2  ;;  %3750 = vst [vmem:[#allocation9_spill] sm:$0xff] %v2744_v12  ;;  %v321_v19 = vld [vmem:[#allocation2 + $0xa0] sm:$0x3]  ;;  %v985_v34 = vld [vmem:[%s3727_s1 + $0x18] sm:$0xff]  ;;  %v983_v40 = vld [vmem:[%s3727_s1 + $0x8] sm:$0xff] }
  0x43   : > { %v2712_v3 = vsel %vm444_vm3, %v470_v61, %v471_v62  ;;  %v473_v5 = vrot.slane %v318_v57, 2  ;;  %v453_v6 = vrot.slane %v306_v58, 2  ;;  %v386_v13 = vrot.slane %v2731_v9, 1  ;;  %v309_v20 = vld [vmem:[#allocation2 + $0x40] sm:$0x3]  ;;  %s3743_s8 = smov 32  }
  0x44   : > { %v452_v4 = vsel %vm444_vm3, %v450_v1, %v451_v2  ;;  %v387_v14 = vrot.slane %v2742_v11, 1  ;;  %v366_v15 = vrot.slane %v2733_v10, 1  ;;  %v367_v16 = vrot.slane %v2744_v12, 1  ;;  %v986_v33 = vld [vmem:[%s3727_s1 + $0x20] sm:$0xf]  ;;  %v2811_v52 = vld [vmem:[#allocation2 + $0xa8] sm:$0xff] }
  0x45   : > { %501 = vrot.lane.b32.xlu1 %v2657_v41, %s2416_s10  ;;  %485 = vrot.lane.b32.xlu0 %v447_v42, %s2416_s10  ;;  %v2725_v7 = vsel %vm444_vm3, %v471_v62, %v473_v5  ;;  %v454_v8 = vsel %vm444_vm3, %v451_v2, %v453_v6  ;;  %v389_v22 = vrot.slane %v321_v19, 1  ;;  %v369_v24 = vrot.slane %v309_v20, 1  ;;  %v982_v42 = vld [vmem:[%s3727_s1] sm:$0xff]  ;;  %3751 = vst [vmem:[#allocation10_spill] sm:$0xff] %v2811_v52  ;;  %v2813_v53 = vld [vmem:[#allocation2 + $0x48] sm:$0xff]  ;;  %v2833_v61 = vld [vmem:[#allocation2 + $0xb0] sm:$0xff] }
  0x46   : > { %v388_v17 = vsel %vm355_vm2, %v386_v13, %v387_v14  ;;  %v368_v18 = vsel %vm355_vm2, %v366_v15, %v367_v16  ;;  %v475_v26 = vrot.slane %v2731_v9, 2  ;;  %v476_v28 = vrot.slane %v2742_v11, 2  ;;  %3752 = vst [vmem:[#allocation11_spill] sm:$0xff] %v2813_v53  ;;  %3753 = vst [vmem:[#allocation12_spill] sm:$0xff] %v2833_v61  ;;  %v2835_v62 = vld [vmem:[#allocation2 + $0x50] sm:$0xff]  ;;  %s2423_s6 = smov 120  }
  0x47   : > { %v390_v25 = vsel %vm355_vm2, %v387_v14, %v389_v22  ;;  %v370_v29 = vsel %vm355_vm2, %v367_v16, %v369_v24  ;;  %v455_v30 = vrot.slane %v2733_v10, 2  ;;  %v456_v32 = vrot.slane %v2744_v12, 2  ;;  %3754 = vst [vmem:[#allocation13_spill] sm:$0xff] %v2835_v62  ;;  %v324_v16 = vld [vmem:[#allocation2 + $0xb8] sm:$0x3]  ;;  %s2426_s11 = smov 64  }
  0x48   : > { %vm1043_vm4 = vcmask 1043456   ;;  %v477_v35 = vsel %vm444_vm3, %v475_v26, %v476_v28  ;;  %v478_v43 = vrot.slane %v321_v19, 2  ;;  %v458_v44 = vrot.slane %v309_v20, 2  ;;  %s2427_s27 = smov 72   ;;  %s2432_s5 = smov 40  }
  0x49   : > { %503 = vrot.lane.b32.xlu1 %v2664_v45, %s2416_s10  ;;  %487 = vrot.lane.b32.xlu0 %v449_v46, %s2416_s10  ;;  %v457_v36 = vsel %vm444_vm3, %v455_v30, %v456_v32  ;;  %v392_v1 = vrot.slane %v2833_v61, 1  ;;  %v371_v2 = vrot.slane %v2813_v53, 1  ;;  %v394_v20 = vrot.slane %v324_v16, 1 }
  0x4a   : > { %2183 = vmatprep.subr.msk.mxu0 %vm1043_vm4, %v986_v33  ;;  %2217 = vmatprep.subr.msk.mxu1 %vm1043_vm4, %v986_v33  ;;  %v479_v46 = vsel %vm444_vm3, %v476_v28, %v478_v43  ;;  %v459_v51 = vsel %vm444_vm3, %v456_v32, %v458_v44  ;;  %v481_v30 = vrot.slane %v2833_v61, 2  ;;  %v460_v32 = vrot.slane %v2813_v53, 2 }
  0x4b   : > { %2184 = vmatpush3.msk.msra.mxu0 %vm1043_vm4, %v986_v33  ;;  %2222 = vmatpush3.msk.msra.mxu1 %vm1043_vm4, %v986_v33  ;;  %v395_v26 = vsel %vm355_vm2, %v392_v1, %v394_v20  ;;  %v461_v33 = vrot.slane %v2835_v62, 2  ;;  %vm863_vm5 = vcmask 64512   ;;  %vm880_vm6 = vcmask 97280  }
  0x4c   : > { %2185 = vmatprep.subr.mxu0 %v985_v34  ;;  %2218 = vmatprep.subr.mxu1 %v985_v34  ;;  %vm897_vm7 = vcmask 130048   ;;  %vm914_vm8 = vcmask 162816   ;;  %vm931_vm9 = vcmask 195584   ;;  %vm948_vm10 = vcmask 228352  }
  0x4d   : > { %551 = vrot.lane.b32.xlu1 %v2670_v47, %s2417_s12  ;;  %535 = vrot.lane.b32.xlu0 %v2672_v48, %s2417_s12  ;;  %vm965_vm11 = vcmask 261120   ;;  %vm994_vm12 = vcmask 293888  }
  0x4e   : > { %2186 = vmatpush3.msra.mxu0 %v985_v34  ;;  %2223 = vmatpush3.msra.mxu1 %v985_v34 }
  0x4f   : > { %2187 = vmatprep.subr.mxu0 %v984_v39  ;;  %2219 = vmatprep.subr.mxu1 %v984_v39 }
  0x50   : > { %2188 = vmatpush3.msra.mxu0 %v984_v39  ;;  %2224 = vmatpush3.msra.mxu1 %v984_v39  ;;  %v462_v39 = vsel %vm444_vm3, %v460_v32, %v461_v33 }
  0x51   : > { %553 = vrot.lane.b32.xlu1 %v2674_v49, %s2417_s12  ;;  %537 = vrot.lane.b32.xlu0 %v2676_v50, %s2417_s12 }
  0x52   : > { %2189 = vmatprep.subr.mxu0 %v983_v40  ;;  %2220 = vmatprep.subr.mxu1 %v983_v40 }
  0x53   : > { %2190 = vmatpush3.msra.mxu0 %v983_v40  ;;  %2225 = vmatpush3.msra.mxu1 %v983_v40 }
  0x54   : > { %2191 = vmatprep.subr.mxu0 %v982_v42  ;;  %2221 = vmatprep.subr.mxu1 %v982_v42 }
  0x55   : > { %605 = vrot.lane.b32.xlu1 %v2691_v55, %s3742_s13  ;;  %589 = vrot.lane.b32.xlu0 %v363_v56, %s3742_s13 }
  0x56   : > { %2192 = vmatpush3.msra.mxu0 %v982_v42  ;;  %2226 = vmatpush3.msra.mxu1 %v982_v42 }
  0x59   : > { %416 = vrot.lane.b32.xlu1 %v2691_v55, %s2415_s9  ;;  %400 = vrot.lane.b32.xlu0 %v363_v56, %s2415_s9 }
  0x5d   : > { %607 = vrot.lane.b32.xlu1 %v2703_v63, %s3742_s13  ;;  %591 = vrot.lane.b32.xlu0 %v365_v0, %s3742_s13 }
  0x61   : > { %658 = vrot.lane.b32.xlu1 %v2712_v3, %s2419_s14  ;;  %642 = vrot.lane.b32.xlu0 %v452_v4, %s2419_s14 }
  0x65   : > { %418 = vrot.lane.b32.xlu1 %v2703_v63, %s2415_s9  ;;  %402 = vrot.lane.b32.xlu0 %v365_v0, %s2415_s9  ;;  %v391_v0 = vrot.slane %v2811_v52, 1 }
  0x69   : > { %505 = vrot.lane.b32.xlu1 %v2712_v3, %s2416_s10  ;;  %489 = vrot.lane.b32.xlu0 %v452_v4, %s2416_s10  ;;  %v372_v4 = vrot.slane %v2835_v62, 1 }
  0x6b   : > { %v373_v13 = vsel %vm355_vm2, %v371_v2, %v372_v4 }
  0x6d   : > { %660 = vrot.lane.b32.xlu1 %v2725_v7, %s2419_s14  ;;  %644 = vrot.lane.b32.xlu0 %v454_v8, %s2419_s14 }
  0x71   : > { %708 = vrot.lane.b32.xlu1 %v2731_v9, %s3744_s23  ;;  %692 = vrot.lane.b32.xlu0 %v2733_v10, %s3744_s23 }
  0x75   : > { %507 = vrot.lane.b32.xlu1 %v2725_v7, %s2416_s10  ;;  %491 = vrot.lane.b32.xlu0 %v454_v8, %s2416_s10  ;;  %v393_v8 = vsel %vm355_vm2, %v391_v0, %v392_v1  ;;  %v483_v0 = vrot.slane %v324_v16, 2 }
  0x79   : > { %555 = vrot.lane.b32.xlu1 %v2731_v9, %s2417_s12  ;;  %539 = vrot.lane.b32.xlu0 %v2733_v10, %s2417_s12 }
  0x7d   : > { %710 = vrot.lane.b32.xlu1 %v2742_v11, %s3744_s23  ;;  %694 = vrot.lane.b32.xlu0 %v2744_v12, %s3744_s23 }
  0x81   : > { %762 = vrot.lane.b32.xlu1 %v388_v17, %s3732_s24  ;;  %746 = vrot.lane.b32.xlu0 %v368_v18, %s3732_s24 }
  0x85   : > { %557 = vrot.lane.b32.xlu1 %v2742_v11, %s2417_s12  ;;  %541 = vrot.lane.b32.xlu0 %v2744_v12, %s2417_s12 }
  0x89   : > { %609 = vrot.lane.b32.xlu1 %v388_v17, %s3742_s13  ;;  %593 = vrot.lane.b32.xlu0 %v368_v18, %s3742_s13 }
  0x8d   : > { %764 = vrot.lane.b32.xlu1 %v390_v25, %s3732_s24  ;;  %748 = vrot.lane.b32.xlu0 %v370_v29, %s3732_s24  ;;  %s3755_s24 = smov 28  }
  0x91   : > { %815 = vrot.lane.b32.xlu1 %v477_v35, %s3743_s8  ;;  %799 = vrot.lane.b32.xlu0 %v457_v36, %s3743_s8 }
  0x95   : > { %420 = vrot.lane.b32.xlu1 %v388_v17, %s2415_s9  ;;  %404 = vrot.lane.b32.xlu0 %v368_v18, %s2415_s9  ;;  %v312_v17 = vld [vmem:[#allocation2 + $0x58] sm:$0x3] }
  0x96   : > { %v374_v22 = vrot.slane %v312_v17, 1  ;;  %v463_v1 = vrot.slane %v312_v17, 2 }
  0x98   : > { %v375_v28 = vsel %vm355_vm2, %v372_v4, %v374_v22 }
  0x99   : > { %611 = vrot.lane.b32.xlu1 %v390_v25, %s3742_s13  ;;  %595 = vrot.lane.b32.xlu0 %v370_v29, %s3742_s13 }
  0x9d   : > { %662 = vrot.lane.b32.xlu1 %v477_v35, %s2419_s14  ;;  %646 = vrot.lane.b32.xlu0 %v457_v36, %s2419_s14 }
  0xa1   : > { %817 = vrot.lane.b32.xlu1 %v479_v46, %s3743_s8  ;;  %801 = vrot.lane.b32.xlu0 %v459_v51, %s3743_s8 }
  0xa5   : > { %422 = vrot.lane.b32.xlu1 %v390_v25, %s2415_s9  ;;  %406 = vrot.lane.b32.xlu0 %v370_v29, %s2415_s9  ;;  %v480_v29 = vrot.slane %v2811_v52, 2 }
  0xa9   : > { %509 = vrot.lane.b32.xlu1 %v477_v35, %s2416_s10  ;;  %493 = vrot.lane.b32.xlu0 %v457_v36, %s2416_s10  ;;  %v482_v36 = vsel %vm444_vm3, %v480_v29, %v481_v30 }
  0xad   : > { %664 = vrot.lane.b32.xlu1 %v479_v46, %s2419_s14  ;;  %648 = vrot.lane.b32.xlu0 %v459_v51, %s2419_s14 }
  0xaf   : > { %v2815_v54 = vpop.permute.xlu1 %398  ;;  %v2817_v56 = vpop.permute.xlu0 %396 }
  0xb0   : > { %v847_v10 = vsel %vm211_vm0, %v2628_v23, %v2817_v56 }
  0xb1   : > { %712 = vrot.lane.b32.xlu1 %v2811_v52, %s3744_s23  ;;  %696 = vrot.lane.b32.xlu0 %v2813_v53, %s3744_s23 }
  0xb3   : > { %v2823_v57 = vpop.permute.xlu1 %414  ;;  %v2825_v58 = vpop.permute.xlu0 %412 }
  0xb4   : > { %v855_v9 = vsel %vm211_vm0, %v2635_v31, %v2825_v58 }
  0xb5   : > { %511 = vrot.lane.b32.xlu1 %v479_v46, %s2416_s10  ;;  %495 = vrot.lane.b32.xlu0 %v459_v51, %s2416_s10 }
  0xb7   : > { %v2829_v59 = vpop.permute.xlu1 %501  ;;  %v2831_v60 = vpop.permute.xlu0 %485 }
  0xb9   : > { %559 = vrot.lane.b32.xlu1 %v2811_v52, %s2417_s12  ;;  %543 = vrot.lane.b32.xlu0 %v2813_v53, %s2417_s12  ;;  %v872_v53 = vsel %vm863_vm5, %v855_v9, %v2829_v59  ;;  %v864_v52 = vsel %vm863_vm5, %v847_v10, %v2831_v60 }
  0xbb   : > { %v2845_v5 = vpop.permute.xlu1 %503  ;;  %v2847_v6 = vpop.permute.xlu0 %487 }
  0xbd   : > { %714 = vrot.lane.b32.xlu1 %v2833_v61, %s3744_s23  ;;  %698 = vrot.lane.b32.xlu0 %v2835_v62, %s3744_s23 }
  0xbf   : > { %v2855_v14 = vpop.permute.xlu1 %551  ;;  %v2857_v15 = vpop.permute.xlu0 %535 }
  0xc0   : > { %v889_v56 = vsel %vm880_vm6, %v872_v53, %v2855_v14 }
  0xc1   : > { %766 = vrot.lane.b32.xlu1 %v393_v8, %s3755_s24  ;;  %750 = vrot.lane.b32.xlu0 %v373_v13, %s3755_s24 }
  0xc3   : > { %v2861_v18 = vpop.permute.xlu1 %553  ;;  %v2863_v19 = vpop.permute.xlu0 %537 }
  0xc5   : > { %561 = vrot.lane.b32.xlu1 %v2833_v61, %s2417_s12  ;;  %545 = vrot.lane.b32.xlu0 %v2835_v62, %s2417_s12  ;;  %v2951_v61 = vld [vmem:[#allocation2 + $0xc8] sm:$0xff] }
  0xc6   : > { %v585_v11 = vrot.slane %v2951_v61, 1 }
  0xc7   : > { %v2869_v24 = vpop.permute.xlu1 %605  ;;  %v2871_v25 = vpop.permute.xlu0 %589 }
  0xc9   : > { %613 = vrot.lane.b32.xlu1 %v393_v8, %s3742_s13  ;;  %597 = vrot.lane.b32.xlu0 %v373_v13, %s3742_s13 }
  0xcb   : > { %v2881_v34 = vpop.permute.xlu1 %416  ;;  %v2883_v35 = vpop.permute.xlu0 %400 }
  0xcd   : > { %768 = vrot.lane.b32.xlu1 %v395_v26, %s3755_s24  ;;  %752 = vrot.lane.b32.xlu0 %v375_v28, %s3755_s24 }
  0xcf   : > { %v2889_v40 = vpop.permute.xlu1 %607  ;;  %v2891_v42 = vpop.permute.xlu0 %591 }
  0xd1   : > { %819 = vrot.lane.b32.xlu1 %v482_v36, %s3743_s8  ;;  %803 = vrot.lane.b32.xlu0 %v462_v39, %s3743_s8 }
  0xd3   : > { %v2895_v43 = vpop.permute.xlu1 %658  ;;  %v2897_v44 = vpop.permute.xlu0 %642 }
  0xd5   : > { %424 = vrot.lane.b32.xlu1 %v393_v8, %s2415_s9  ;;  %408 = vrot.lane.b32.xlu0 %v373_v13, %s2415_s9  ;;  %v484_v8 = vsel %vm444_vm3, %v481_v30, %v483_v0  ;;  %v464_v13 = vsel %vm444_vm3, %v461_v33, %v463_v1  ;;  %v2935_v0 = vld [vmem:[#allocation2 + $0xc0] sm:$0xff] }
  0xd6   : > { %v584_v12 = vrot.slane %v2935_v0, 1 }
  0xd7   : > { %v2901_v46 = vpop.permute.xlu1 %418  ;;  %v2903_v51 = vpop.permute.xlu0 %402 }
  0xd8   : > { %v586_v23 = vsel %vm355_vm2, %v584_v12, %v585_v11 }
  0xd9   : > { %615 = vrot.lane.b32.xlu1 %v395_v26, %s3742_s13  ;;  %599 = vrot.lane.b32.xlu0 %v375_v28, %s3742_s13 }
  0xdb   : > { %v2907_v2 = vpop.permute.xlu1 %505  ;;  %v2909_v4 = vpop.permute.xlu0 %489 }
  0xdd   : > { %666 = vrot.lane.b32.xlu1 %v482_v36, %s2419_s14  ;;  %650 = vrot.lane.b32.xlu0 %v462_v39, %s2419_s14 }
  0xdf   : > { %v2915_v20 = vpop.permute.xlu1 %660  ;;  %v2917_v22 = vpop.permute.xlu0 %644 }
  0xe1   : > { %821 = vrot.lane.b32.xlu1 %v484_v8, %s3743_s8  ;;  %805 = vrot.lane.b32.xlu0 %v464_v13, %s3743_s8 }
  0xe3   : > { %v709_v16 = vpop.permute.xlu1 %708  ;;  %v693_v17 = vpop.permute.xlu0 %692 }
  0xe5   : > { %426 = vrot.lane.b32.xlu1 %v395_v26, %s2415_s9  ;;  %410 = vrot.lane.b32.xlu0 %v375_v28, %s2415_s9  ;;  %s2429_s9 = smov 88  }
  0xe7   : > { %v2923_v29 = vpop.permute.xlu1 %507  ;;  %v2925_v32 = vpop.permute.xlu0 %491 }
  0xe9   : > { %513 = vrot.lane.b32.xlu1 %v482_v36, %s2416_s10  ;;  %497 = vrot.lane.b32.xlu0 %v462_v39, %s2416_s10 }
  0xeb   : > { %v2929_v30 = vpop.permute.xlu1 %555  ;;  %v2931_v33 = vpop.permute.xlu0 %539 }
  0xed   : > { %668 = vrot.lane.b32.xlu1 %v484_v8, %s2419_s14  ;;  %652 = vrot.lane.b32.xlu0 %v464_v13, %s2419_s14 }
  0xef   : > { %v2937_v26 = vpop.permute.xlu1 %710  ;;  %v2939_v28 = vpop.permute.xlu0 %694 }
  0xf1   : > { %716 = vrot.lane.b32.xlu1 %v2935_v0, %s3744_s23  ;;  %700 = vrot.lane.b32.xlu0 %v2635_v31, %s3744_s23 }
  0xf3   : > { %v763_v36 = vpop.permute.xlu1 %762  ;;  %v747_v39 = vpop.permute.xlu0 %746 }
  0xf5   : > { %515 = vrot.lane.b32.xlu1 %v484_v8, %s2416_s10  ;;  %499 = vrot.lane.b32.xlu0 %v464_v13, %s2416_s10 }
  0xf7   : > { %v2947_v1 = vpop.permute.xlu1 %557  ;;  %v2949_v62 = vpop.permute.xlu0 %541 }
  0xf8   : > { %3756 = vst [vmem:[#allocation14_spill] sm:$0xff] %v2947_v1  ;;  %3757 = vst [vmem:[#allocation15_spill] sm:$0xff] %v2949_v62  ;;  %v906_v1 = vsel %vm897_vm7, %v889_v56, %v2869_v24  ;;  %v327_v24 = vld [vmem:[#allocation2 + $0xd0] sm:$0x3]  ;;  %v856_v56 = vsel %vm211_vm0, %v2632_v27, %v2823_v57 }
  0xf9   : > { %563 = vrot.lane.b32.xlu1 %v2935_v0, %s2417_s12  ;;  %547 = vrot.lane.b32.xlu0 %v2635_v31, %s2417_s12  ;;  %v881_v31 = vsel %vm880_vm6, %v864_v52, %v2857_v15  ;;  %v923_v10 = vsel %vm914_vm8, %v906_v1, %v2895_v43 }
  0xfa   : > { %v898_v9 = vsel %vm897_vm7, %v881_v31, %v2871_v25  ;;  %v940_v52 = vsel %vm931_vm9, %v923_v10, %v709_v16 }
  0xfb   : > { %v2959_v8 = vpop.permute.xlu1 %609  ;;  %v2961_v13 = vpop.permute.xlu0 %593  ;;  %v915_v12 = vsel %vm914_vm8, %v898_v9, %v2897_v44  ;;  %v957_v59 = vsel %vm948_vm10, %v940_v52, %v763_v36  ;;  %v587_v44 = vrot.slane %v327_v24, 1  ;;  %v637_v36 = vrot.slane %v2935_v0, 2 }
  0xfc   : > { %v932_v53 = vsel %vm931_vm9, %v915_v12, %v693_v17 }
  0xfd   : > { %718 = vrot.lane.b32.xlu1 %v2951_v61, %s3744_s23  ;;  %702 = vrot.lane.b32.xlu0 %v2632_v27, %s3744_s23  ;;  %v949_v60 = vsel %vm948_vm10, %v932_v53, %v747_v39  ;;  %v638_v39 = vrot.slane %v2951_v61, 2  ;;  %v588_v1 = vsel %vm355_vm2, %v585_v11, %v587_v44 }
  0xff   : > { %v765_v58 = vpop.permute.xlu1 %764  ;;  %v749_v62 = vpop.permute.xlu0 %748 }
 0x101   : > { %770 = vrot.lane.b32.xlu1 %v586_v23, %s3755_s24  ;;  %754 = vrot.lane.b32.xlu0 %v2648_v38, %s3755_s24 }
 0x103   : > { %v816_v14 = vpop.permute.xlu1 %815  ;;  %v800_v15 = vpop.permute.xlu0 %799 }
 0x104   : > { %v974_v25 = vsel %vm965_vm11, %v957_v59, %v816_v14  ;;  %v966_v43 = vsel %vm965_vm11, %v949_v60, %v800_v15 }
 0x105   : > { %565 = vrot.lane.b32.xlu1 %v2951_v61, %s2417_s12  ;;  %2205 = vmatprep.mubr.msk.f32.mxu1 %vm994_vm12, %v974_v25  ;;  %v873_v61 = vsel %vm863_vm5, %v856_v56, %v2845_v5 }
 0x106   : > { %549 = vrot.lane.b32.xlu0 %v2632_v27, %s2417_s12  ;;  %2193 = vmatprep.mubr.msk.f32.mxu0 %vm994_vm12, %v966_v43  ;;  %v639_v27 = vsel %vm444_vm3, %v637_v36, %v638_v39  ;;  %v890_v11 = vsel %vm880_vm6, %v873_v61, %v2861_v18  ;;  %s2430_s12 = smov 96  }
 0x107   : > { %v3005_v16 = vpop.permute.xlu1 %420  ;;  %v3007_v17 = vpop.permute.xlu0 %404  ;;  %v907_v5 = vsel %vm897_vm7, %v890_v11, %v2889_v40 }
 0x108   : > { %v924_v0 = vsel %vm914_vm8, %v907_v5, %v2915_v20 }
 0x109   : > { %617 = vrot.lane.b32.xlu1 %v586_v23, %s3742_s13  ;;  %v848_v23 = vsel %vm211_vm0, %v2626_v21, %v2815_v54  ;;  %v941_v18 = vsel %vm931_vm9, %v924_v0, %v2937_v26  ;;  %v640_v26 = vrot.slane %v327_v24, 2  ;;  %v329_v24 = vld [vmem:[#allocation2 + $0xe0] sm:$0xff] }
 0x10a   : > { %601 = vrot.lane.b32.xlu0 %v2648_v38, %s3742_s13  ;;  %v865_v38 = vsel %vm863_vm5, %v848_v23, %v2847_v6  ;;  %v958_v40 = vsel %vm948_vm10, %v941_v18, %v765_v58  ;;  %v742_v43 = vrot.slane %v329_v24, 1 }
 0x10b   : > { %v3018_v31 = vpop.permute.xlu1 %611  ;;  %v3020_v9 = vpop.permute.xlu0 %595  ;;  %v882_v57 = vsel %vm880_vm6, %v865_v38, %v2863_v19  ;;  %v795_v38 = vrot.slane %v329_v24, 2 }
 0x10c   : > { %v899_v6 = vsel %vm897_vm7, %v882_v57, %v2891_v42 }
 0x10d   : > { %772 = vrot.lane.b32.xlu1 %v588_v1, %s3755_s24  ;;  %v916_v10 = vsel %vm914_vm8, %v899_v6, %v2917_v22 }
 0x10e   : > { %756 = vrot.lane.b32.xlu0 %v2645_v37, %s3755_s24  ;;  %v933_v19 = vsel %vm931_vm9, %v916_v10, %v2939_v28 }
 0x10f   : > { %v3037_v21 = vpop.permute.xlu1 %662  ;;  %v3039_v54 = vpop.permute.xlu0 %646  ;;  %v950_v42 = vsel %vm948_vm10, %v933_v19, %v749_v62  ;;  %v641_v62 = vsel %vm444_vm3, %v638_v39, %v640_v26  ;;  %v330_v39 = vld [vmem:[#allocation2 + $0xe8] sm:$0x3] }
 0x110   : > { %v797_v6 = vrot.slane %v330_v39, 2 }
 0x111   : > { %823 = vrot.lane.b32.xlu1 %v639_v27, %s3743_s8 }
 0x112   : > { %807 = vrot.lane.b32.xlu0 %v2657_v41, %s3743_s8 }
 0x113   : > { %v818_v12 = vpop.permute.xlu1 %817  ;;  %v802_v20 = vpop.permute.xlu0 %801 }
 0x114   : > { %v975_v52 = vsel %vm965_vm11, %v958_v40, %v818_v12  ;;  %v967_v22 = vsel %vm965_vm11, %v950_v42, %v802_v20  ;;  %v857_v42 = vsel %vm211_vm0, %v2670_v47, %v2881_v34 }
 0x115   : > { %619 = vrot.lane.b32.xlu1 %v588_v1, %s3742_s13  ;;  %2206 = vmatmul.mubr.msk.f32.vlgmr.msra.gmra.mxu1 %vm994_vm12, %v975_v52  ;;  %v744_v1 = vrot.slane %v330_v39, 1  ;;  %v874_v12 = vsel %vm863_vm5, %v857_v42, %v2907_v2  ;;  %v3761_v42 = vld [vmem:[#allocation11_spill] sm:$0xff] }
 0x116   : > { %603 = vrot.lane.b32.xlu0 %v2645_v37, %s3742_s13  ;;  %2194 = vmatmul.mubr.msk.f32.vlgmr.msra.gmra.mxu0 %vm994_vm12, %v967_v22 }
 0x117   : > { %v3065_v28 = vpop.permute.xlu1 %422  ;;  %v3067_v58 = vpop.permute.xlu0 %406 }
 0x119   : > { %670 = vrot.lane.b32.xlu1 %v639_v27, %s2419_s14  ;;  %v745_v27 = vsel %vm355_vm2, %v742_v43, %v744_v1 }
 0x11a   : > { %654 = vrot.lane.b32.xlu0 %v2657_v41, %s2419_s14  ;;  %v328_v41 = vld [vmem:[#allocation2 + $0xd8] sm:$0xff] }
 0x11b   : > { %v3073_v53 = vpop.permute.xlu1 %509  ;;  %v3075_v59 = vpop.permute.xlu0 %493  ;;  %v741_v25 = vrot.slane %v328_v41, 1  ;;  %v794_v61 = vrot.slane %v328_v41, 2 }
 0x11d   : > { %825 = vrot.lane.b32.xlu1 %v641_v62, %s3743_s8  ;;  %v796_v5 = vsel %vm444_vm3, %v794_v61, %v795_v38  ;;  %v3759_v61 = vld [vmem:[#allocation15_spill] sm:$0xff] }
 0x11e   : > { %809 = vrot.lane.b32.xlu0 %v2664_v45, %s3743_s8 }
 0x11f   : > { %v3080_v37 = vpop.permute.xlu1 %664  ;;  %v3082_v60 = vpop.permute.xlu0 %648 }
 0x121   : > { %672 = vrot.lane.b32.xlu1 %v641_v62, %s2419_s14 }
 0x122   : > { %656 = vrot.lane.b32.xlu0 %v2664_v45, %s2419_s14  ;;  %v743_v45 = vsel %vm355_vm2, %v741_v25, %v742_v43  ;;  %v850_v25 = vsel %vm211_vm0, %v2676_v50, %v2903_v51  ;;  %s2431_s14 = smov 104  }
 0x123   : > { %v713_v14 = vpop.permute.xlu1 %712  ;;  %v697_v15 = vpop.permute.xlu0 %696  ;;  %v867_v39 = vsel %vm863_vm5, %v850_v25, %v2925_v32 }
 0x125   : > { %720 = vrot.lane.b32.xlu1 %v328_v41, %s3744_s23 }
 0x126   : > { %704 = vrot.lane.b32.xlu0 %v2670_v47, %s3744_s23 }
 0x127   : > { %v3090_v44 = vpop.permute.xlu1 %511  ;;  %v3092_v36 = vpop.permute.xlu0 %495 }
 0x129   : > { %722 = vrot.lane.b32.xlu1 %v329_v24, %s3744_s23 }
 0x12a   : > { %706 = vrot.lane.b32.xlu0 %v2674_v49, %s3744_s23 }
 0x12b   : > { %v3098_v56 = vpop.permute.xlu1 %559  ;;  %v3100_v23 = vpop.permute.xlu0 %543 }
 0x12d   : > { %774 = vrot.lane.b32.xlu1 %v743_v45, %s3755_s24  ;;  %v3758_v45 = vld [vmem:[#allocation14_spill] sm:$0xff] }
 0x12e   : > { %758 = vrot.lane.b32.xlu0 %v2691_v55, %s3755_s24  ;;  %v798_v55 = vsel %vm444_vm3, %v795_v38, %v797_v6  ;;  %v884_v38 = vsel %vm880_vm6, %v867_v39, %v3759_v61 }
 0x12f   : > { %v715_v11 = vpop.permute.xlu1 %714  ;;  %v699_v57 = vpop.permute.xlu0 %698  ;;  %v901_v50 = vsel %vm897_vm7, %v884_v38, %v3020_v9 }
 0x130   : > { %v918_v51 = vsel %vm914_vm8, %v901_v50, %v3082_v60 }
 0x131   : > { %776 = vrot.lane.b32.xlu1 %v745_v27, %s3755_s24  ;;  %v935_v32 = vsel %vm931_vm9, %v918_v51, %v699_v57 }
 0x132   : > { %760 = vrot.lane.b32.xlu0 %v2703_v63, %s3755_s24  ;;  %s2428_s24 = smov 80  }
 0x133   : > { %v767_v0 = vpop.permute.xlu1 %766  ;;  %v751_v10 = vpop.permute.xlu0 %750 }
 0x135   : > { %827 = vrot.lane.b32.xlu1 %v796_v5, %s3743_s8 }
 0x136   : > { %811 = vrot.lane.b32.xlu0 %v2712_v3, %s3743_s8  ;;  %v849_v3 = vsel %vm211_vm0, %v2672_v48, %v2883_v35 }
 0x137   : > { %v3114_v18 = vpop.permute.xlu1 %561  ;;  %v3116_v19 = vpop.permute.xlu0 %545  ;;  %v866_v20 = vsel %vm863_vm5, %v849_v3, %v2909_v4 }
 0x138   : > { %v883_v52 = vsel %vm880_vm6, %v866_v20, %v2931_v33 }
 0x139   : > { %829 = vrot.lane.b32.xlu1 %v798_v55, %s3743_s8  ;;  %v900_v48 = vsel %vm897_vm7, %v883_v52, %v2961_v13 }
 0x13a   : > { %813 = vrot.lane.b32.xlu0 %v2725_v7, %s3743_s8  ;;  %v891_v7 = vsel %vm880_vm6, %v874_v12, %v2929_v30  ;;  %v917_v35 = vsel %vm914_vm8, %v900_v48, %v3039_v54 }
 0x13b   : > { %v3121_v63 = vpop.permute.xlu1 %613  ;;  %v3123_v40 = vpop.permute.xlu0 %597  ;;  %v908_v47 = vsel %vm897_vm7, %v891_v7, %v2959_v8  ;;  %v934_v4 = vsel %vm931_vm9, %v917_v35, %v697_v15  ;;  %v858_v15 = vsel %vm211_vm0, %v2674_v49, %v2901_v46 }
 0x13c   : > { %v925_v34 = vsel %vm914_vm8, %v908_v47, %v3037_v21  ;;  %v951_v33 = vsel %vm948_vm10, %v934_v4, %v751_v10  ;;  %v875_v43 = vsel %vm863_vm5, %v858_v15, %v2923_v29  ;;  %v3762_v15 = vld [vmem:[#allocation6_spill] sm:$0xff] }
 0x13d   : > { %v942_v2 = vsel %vm931_vm9, %v925_v34, %v713_v14  ;;  %v892_v1 = vsel %vm880_vm6, %v875_v43, %v3758_v45  ;;  %v859_v25 = vsel %vm211_vm0, %v3762_v15, %v3005_v16  ;;  %v3763_v43 = vld [vmem:[#allocation7_spill] sm:$0xff] }
 0x13e   : > { %v959_v30 = vsel %vm948_vm10, %v942_v2, %v767_v0  ;;  %v909_v49 = vsel %vm897_vm7, %v892_v1, %v3018_v31  ;;  %v851_v39 = vsel %vm211_vm0, %v3763_v43, %v3007_v17  ;;  %v876_v45 = vsel %vm863_vm5, %v859_v25, %v3073_v53 }
 0x13f   : > { %v769_v22 = vpop.permute.xlu1 %768  ;;  %v753_v26 = vpop.permute.xlu0 %752  ;;  %v926_v46 = vsel %vm914_vm8, %v909_v49, %v3080_v37  ;;  %v868_v1 = vsel %vm863_vm5, %v851_v39, %v3075_v59  ;;  %v893_v61 = vsel %vm880_vm6, %v876_v45, %v3098_v56 }
 0x140   : > { %v943_v29 = vsel %vm931_vm9, %v926_v46, %v715_v11  ;;  %v952_v0 = vsel %vm948_vm10, %v935_v32, %v753_v26  ;;  %v3760_v11 = vld [vmem:[#allocation10_spill] sm:$0xff]  ;;  %v885_v49 = vsel %vm880_vm6, %v868_v1, %v3100_v23  ;;  %v910_v16 = vsel %vm897_vm7, %v893_v61, %v3121_v63 }
 0x141   : > { %v960_v6 = vsel %vm948_vm10, %v943_v29, %v769_v22  ;;  %v902_v17 = vsel %vm897_vm7, %v885_v49, %v3123_v40 }
 0x143   : > { %v820_v62 = vpop.permute.xlu1 %819  ;;  %v804_v41 = vpop.permute.xlu0 %803 }
 0x144   : > { %v976_v8 = vsel %vm965_vm11, %v959_v30, %v820_v62  ;;  %v968_v13 = vsel %vm965_vm11, %v951_v33, %v804_v41 }
 0x145   : > { %2196 = vmatprep.mubr.msk.f32.mxu0 %vm994_vm12, %v968_v13  ;;  %2208 = vmatprep.mubr.msk.f32.mxu1 %vm994_vm12, %v976_v8 }
 0x147   : > { %v425_v21 = vpop.permute.xlu1 %424  ;;  %v409_v54 = vpop.permute.xlu0 %408 }
 0x148   : > { %v861_v57 = vsel %vm211_vm0, %v3760_v11, %v425_v21  ;;  %v853_v3 = vsel %vm211_vm0, %v3761_v42, %v409_v54 }
 0x14b   : > { %v3155_v24 = vpop.permute.xlu1 %615  ;;  %v3157_v14 = vpop.permute.xlu0 %599 }
 0x14f   : > { %v667_v27 = vpop.permute.xlu1 %666  ;;  %v651_v5 = vpop.permute.xlu0 %650 }
 0x150   : > { %v927_v46 = vsel %vm914_vm8, %v910_v16, %v667_v27  ;;  %v919_v53 = vsel %vm914_vm8, %v902_v17, %v651_v5  ;;  %v3764_v5 = vld [vmem:[#allocation8_spill] sm:$0xff]  ;;  %v3767_v17 = vld [vmem:[#allocation13_spill] sm:$0xff] }
 0x153   : > { %v822_v10 = vpop.permute.xlu1 %821  ;;  %v806_v55 = vpop.permute.xlu0 %805 }
 0x154   : > { %v977_v31 = vsel %vm965_vm11, %v960_v6, %v822_v10  ;;  %v969_v9 = vsel %vm965_vm11, %v952_v0, %v806_v55  ;;  %v860_v0 = vsel %vm211_vm0, %v3764_v5, %v3065_v28  ;;  %v3765_v10 = vld [vmem:[#allocation9_spill] sm:$0xff] }
 0x155   : > { %2197 = vmatmul.mubr.msk.f32.gmra.mxu0 %vm994_vm12, %v969_v9  ;;  %2209 = vmatmul.mubr.msk.f32.gmra.mxu1 %vm994_vm12, %v977_v31  ;;  %v852_v55 = vsel %vm211_vm0, %v3765_v10, %v3067_v58  ;;  %v877_v31 = vsel %vm863_vm5, %v860_v0, %v3090_v44  ;;  %v3318_v10 = vld [vmem:[%s3728_s2] ss:$0 sm:$0xff] }
 0x156   : > { %v869_v9 = vsel %vm863_vm5, %v852_v55, %v3092_v36  ;;  %v894_v11 = vsel %vm880_vm6, %v877_v31, %v3114_v18 }
 0x157   : > { %v3189_v37 = vpop.permute.xlu1 %426  ;;  %v3191_v60 = vpop.permute.xlu0 %410  ;;  %v886_v42 = vsel %vm880_vm6, %v869_v9, %v3116_v19  ;;  %v911_v28 = vsel %vm897_vm7, %v894_v11, %v3155_v24  ;;  %v3323_v9 = vld [vmem:[%s3729_s3] ss:$0 sm:$0xff] }
 0x158   : > { %v903_v58 = vsel %vm897_vm7, %v886_v42, %v3157_v14 }
 0x15b   : > { %v514_v12 = vpop.permute.xlu1 %513  ;;  %v498_v20 = vpop.permute.xlu0 %497 }
 0x15c   : > { %v3198_v7 = vsel %vm863_vm5, %v861_v57, %v514_v12  ;;  %v3201_v52 = vsel %vm863_vm5, %v853_v3, %v498_v20 }
 0x15f   : > { %v669_v22 = vpop.permute.xlu1 %668  ;;  %v653_v26 = vpop.permute.xlu0 %652 }
 0x160   : > { %v928_v12 = vsel %vm914_vm8, %v911_v28, %v669_v22  ;;  %v920_v44 = vsel %vm914_vm8, %v903_v58, %v653_v26 }
 0x163   : > { %v717_v47 = vpop.permute.xlu1 %716  ;;  %v701_v48 = vpop.permute.xlu0 %700 }
 0x164   : > { %v944_v59 = vsel %vm931_vm9, %v927_v46, %v717_v47  ;;  %v936_v51 = vsel %vm931_vm9, %v919_v53, %v701_v48 }
 0x167   : > { %v3203_v34 = vpop.permute.xlu1 %515  ;;  %v3205_v35 = vpop.permute.xlu0 %499 }
 0x16b   : > { %v3207_v2 = vpop.permute.xlu1 %563  ;;  %v3209_v4 = vpop.permute.xlu0 %547 }
 0x16c   : > { %v895_v43 = vsel %vm880_vm6, %v3198_v7, %v3207_v2  ;;  %v887_v45 = vsel %vm880_vm6, %v3201_v52, %v3209_v4  ;;  %v854_v7 = vsel %vm211_vm0, %v3767_v17, %v3191_v60 }
 0x16f   : > { %v719_v30 = vpop.permute.xlu1 %718  ;;  %v703_v33 = vpop.permute.xlu0 %702 }
 0x170   : > { %v945_v36 = vsel %vm931_vm9, %v928_v12, %v719_v30  ;;  %v937_v20 = vsel %vm931_vm9, %v920_v44, %v703_v33 }
 0x173   : > { %v771_v62 = vpop.permute.xlu1 %770  ;;  %v755_v41 = vpop.permute.xlu0 %754 }
 0x174   : > { %v961_v56 = vsel %vm948_vm10, %v944_v59, %v771_v62  ;;  %v953_v23 = vsel %vm948_vm10, %v936_v51, %v755_v41 }
 0x177   : > { %v3211_v8 = vpop.permute.xlu1 %565 }
 0x178   : > { %v3213_v13 = vpop.permute.xlu0 %549 }
 0x17b   : > { %v618_v21 = vpop.permute.xlu1 %617 }
 0x17c   : > { %v602_v54 = vpop.permute.xlu0 %601  ;;  %v912_v1 = vsel %vm897_vm7, %v895_v43, %v618_v21  ;;  %v871_v21 = vsel %vm863_vm5, %v854_v7, %v3205_v35 }
 0x17d   : > { %v904_v16 = vsel %vm897_vm7, %v887_v45, %v602_v54  ;;  %v888_v60 = vsel %vm880_vm6, %v871_v21, %v3213_v13 }
 0x17f   : > { %v773_v38 = vpop.permute.xlu1 %772 }
 0x180   : > { %v757_v50 = vpop.permute.xlu0 %756  ;;  %v962_v18 = vsel %vm948_vm10, %v945_v36, %v773_v38  ;;  %v3766_v38 = vld [vmem:[#allocation12_spill] sm:$0xff] }
 0x181   : > { %v954_v19 = vsel %vm948_vm10, %v937_v20, %v757_v50  ;;  %v862_v49 = vsel %vm211_vm0, %v3766_v38, %v3189_v37 }
 0x182   : > { %v879_v2 = vsel %vm863_vm5, %v862_v49, %v3203_v34 }
 0x183   : > { %v824_v29 = vpop.permute.xlu1 %823  ;;  %v896_v37 = vsel %vm880_vm6, %v879_v2, %v3211_v8 }
 0x184   : > { %v978_v32 = vsel %vm965_vm11, %v961_v56, %v824_v29  ;;  %v808_v63 = vpop.permute.xlu0 %807 }
 0x185   : > { %v970_v6 = vsel %vm965_vm11, %v953_v23, %v808_v63  ;;  %2211 = vmatprep.mubr.msk.f32.mxu1 %vm994_vm12, %v978_v32 }
 0x186   : > { %2199 = vmatprep.mubr.msk.f32.mxu0 %vm994_vm12, %v970_v6 }
 0x187   : > { %v620_v40 = vpop.permute.xlu1 %619 }
 0x188   : > { %v604_v27 = vpop.permute.xlu0 %603  ;;  %v913_v34 = vsel %vm897_vm7, %v896_v37, %v620_v40 }
 0x189   : > { %v905_v35 = vsel %vm897_vm7, %v888_v60, %v604_v27  ;;  %v2424_v60 = vmov 1983009808  }
 0x18b   : > { %v671_v57 = vpop.permute.xlu1 %670 }
 0x18c   : > { %v655_v3 = vpop.permute.xlu0 %654  ;;  %v929_v50 = vsel %vm914_vm8, %v912_v1, %v671_v57 }
 0x18d   : > { %v921_v52 = vsel %vm914_vm8, %v904_v16, %v655_v3 }
 0x18f   : > { %v826_v47 = vpop.permute.xlu1 %825 }
 0x190   : > { %v979_v48 = vsel %vm965_vm11, %v962_v18, %v826_v47  ;;  %v810_v24 = vpop.permute.xlu0 %809 }
 0x191   : > { %v971_v62 = vsel %vm965_vm11, %v954_v19, %v810_v24  ;;  %2212 = vmatmul.mubr.msk.f32.gmra.mxu1 %vm994_vm12, %v979_v48 }
 0x192   : > { %2200 = vmatmul.mubr.msk.f32.gmra.mxu0 %vm994_vm12, %v971_v62 }
 0x193   : > { %v673_v14 = vpop.permute.xlu1 %672 }
 0x194   : > { %v657_v22 = vpop.permute.xlu0 %656  ;;  %v930_v29 = vsel %vm914_vm8, %v913_v34, %v673_v14  ;;  %v1250_v34 = vunpack.c.l.s4 %v2424_v60 }
 0x195   : > { %v922_v23 = vsel %vm914_vm8, %v905_v35, %v657_v22 }
 0x196   : > { %v1251_v35 = vunpack.c.0.s8 %v1250_v34 }
 0x197   : > { %v721_v26 = vpop.permute.xlu1 %720 }
 0x198   : > { %v705_v30 = vpop.permute.xlu0 %704  ;;  %v946_v4 = vsel %vm931_vm9, %v929_v50, %v721_v26 }
 0x199   : > { %v938_v54 = vsel %vm931_vm9, %v921_v52, %v705_v30 }
 0x19b   : > { %v723_v41 = vpop.permute.xlu1 %722 }
 0x19c   : > { %v707_v33 = vpop.permute.xlu0 %706  ;;  %v947_v32 = vsel %vm931_vm9, %v930_v29, %v723_v41 }
 0x19d   : > { %v939_v13 = vsel %vm931_vm9, %v922_v23, %v707_v33 }
 0x19f   : > { %v775_v15 = vpop.permute.xlu1 %774 }
 0x1a0   : > { %v759_v25 = vpop.permute.xlu0 %758  ;;  %v963_v46 = vsel %vm948_vm10, %v946_v4, %v775_v15 }
 0x1a1   : > { %v955_v59 = vsel %vm948_vm10, %v938_v54, %v759_v25 }
 0x1a3   : > { %v777_v39 = vpop.permute.xlu1 %776 }
 0x1a4   : > { %v761_v61 = vpop.permute.xlu0 %760  ;;  %v964_v63 = vsel %vm948_vm10, %v947_v32, %v777_v39 }
 0x1a5   : > { %v956_v40 = vsel %vm948_vm10, %v939_v13, %v761_v61 }
 0x1a7   : > { %v828_v53 = vpop.permute.xlu1 %827 }
 0x1a8   : > { %v980_v51 = vsel %vm965_vm11, %v963_v46, %v828_v53  ;;  %v812_v56 = vpop.permute.xlu0 %811 }
 0x1a9   : > { %v972_v8 = vsel %vm965_vm11, %v955_v59, %v812_v56  ;;  %2214 = vmatprep.mubr.msk.f32.mxu1 %vm994_vm12, %v980_v51  ;;  %v1252_v59 = vlaneseq }
 0x1aa   : > { %2202 = vmatprep.mubr.msk.f32.mxu0 %vm994_vm12, %v972_v8  ;;  %v2425_v8 = vmov 1934713408  }
 0x1ab   : > { %v830_v6 = vpop.permute.xlu1 %829  ;;  %v1253_v29 = vshrl.u32 %v1252_v59, 7  ;;  %v1314_v23 = vunpack.c.l.s4 %v2425_v8 }
 0x1ac   : > { %v981_v27 = vsel %vm965_vm11, %v964_v63, %v830_v6  ;;  %v814_v5 = vpop.permute.xlu0 %813 }
 0x1ad   : > { %v973_v0 = vsel %vm965_vm11, %v956_v40, %v814_v5  ;;  %2215 = vmatmul.mubr.msk.f32.gmra.mxu1 %vm994_vm12, %v981_v27  ;;  %v3388_v40 = vsub.s32 %v1251_v35, %v1253_v29 }
 0x1ae   : > { %2203 = vmatmul.mubr.msk.f32.gmra.mxu0 %vm994_vm12, %v973_v0  ;;  %v1315_v0 = vunpack.c.0.s8 %v1314_v23 }
 0x1d5   : > { %v2207_v55 = vpop.f32.mrf.mxu1 }
 0x1d6   : > { %v2195_v31 = vpop.f32.mrf.mxu0  ;;  %v1159_v7 = vadd.f32 %v2207_v55, %v3318_v10 }
 0x1d7   : > { %v1119_v11 = vadd.f32 %v2195_v31, %v3318_v10  ;;  %v1153_v42 = vpop.f32.mrf.mxu1 }
 0x1d8   : > { %v1113_v57 = vpop.f32.mrf.mxu0  ;;  %v1154_v12 = vadd.f32 %v3318_v10, %v1153_v42  ;;  %v1224_v4 = vmul.f32 %v3323_v9, %v1159_v7  ;;  %vm1202_vm8 = vcmp.gt.f32.partialorder %v1159_v7, 0.0 }
 0x1d9   : > { %vm1194_vm13 = vcmp.gt.f32.partialorder %v1119_v11, 0.0  ;;  %v1216_v28 = vmul.f32 %v3323_v9, %v1119_v11  ;;  %v1114_v3 = vadd.f32 %v3318_v10, %v1113_v57 }
 0x1da   : > { %v1223_v36 = vmul.f32 %v3323_v9, %v1154_v12  ;;  %vm1201_vm15 = vcmp.gt.f32.partialorder %v1154_v12, 0.0  ;;  %v1240_v46 = vsel %vm1202_vm8, %v1159_v7, %v1224_v4  ;;  %vm1593_vm8 = vcmask 654336  }
 0x1db   : > { %v1215_v58 = vmul.f32 %v3323_v9, %v1114_v3  ;;  %v3330_v44 = vsel %vm1194_vm13, %v1119_v11, %v1216_v28  ;;  %vm1193_vm14 = vcmp.gt.f32.partialorder %v1114_v3, 0.0 }
 0x1dc   : > { %1623 = vrot.lane.b32.xlu0 %v3330_v44, %s2423_s6  ;;  %v3339_v18 = vsel %vm1201_vm15, %v1154_v12, %v1223_v36 }
 0x1dd   : > { %v3335_v20 = vsel %vm1193_vm14, %v1114_v3, %v1215_v58 }
 0x1e0   : > { %1621 = vrot.lane.b32.xlu0 %v3335_v20, %s2423_s6 }
 0x1e4   : > { %1637 = vrot.lane.b32.xlu0 %v3339_v18, %s2423_s6 }
 0x215   : > { %v2198_v47 = vpop.f32.mrf.mxu0  ;;  %v2210_v19 = vpop.f32.mrf.mxu1 }
 0x216   : > { %v1129_v48 = vadd.f32 %v2198_v47, %v3318_v10  ;;  %v1169_v53 = vadd.f32 %v2210_v19, %v3318_v10 }
 0x217   : > { %v1123_v24 = vpop.f32.mrf.mxu0  ;;  %v1163_v62 = vpop.f32.mrf.mxu1 }
 0x218   : > { %vm1196_vm0 = vcmp.gt.f32.partialorder %v1129_v48, 0.0  ;;  %v1218_v14 = vmul.f32 %v3323_v9, %v1129_v48  ;;  %v1124_v22 = vadd.f32 %v3318_v10, %v1123_v24  ;;  %v1164_v26 = vadd.f32 %v3318_v10, %v1163_v62 }
 0x219   : > { %v1226_v56 = vmul.f32 %v3323_v9, %v1169_v53  ;;  %vm1204_vm12 = vcmp.gt.f32.partialorder %v1169_v53, 0.0 }
 0x21a   : > { %v3347_v30 = vsel %vm1196_vm0, %v1129_v48, %v1218_v14  ;;  %vm1195_vm1 = vcmp.gt.f32.partialorder %v1124_v22, 0.0  ;;  %v1217_v41 = vmul.f32 %v3323_v9, %v1124_v22  ;;  %v1225_v33 = vmul.f32 %v3323_v9, %v1164_v26 }
 0x21b   : > { %1627 = vrot.lane.b32.xlu1 %v3347_v30, %s2423_s6  ;;  %vm1203_vm2 = vcmp.gt.f32.partialorder %v1164_v26, 0.0  ;;  %v1242_v6 = vsel %vm1204_vm12, %v1169_v53, %v1226_v56  ;;  %vm1597_vm12 = vcmask 785408  }
 0x21c   : > { %v3353_v15 = vsel %vm1195_vm1, %v1124_v22, %v1217_v41  ;;  %v3357_v25 = vsel %vm1203_vm2, %v1164_v26, %v1225_v33  ;;  %vm1583_vm1 = vcmask 326656   ;;  %vm1585_vm2 = vcmask 392192  }
 0x21f   : > { %1625 = vrot.lane.b32.xlu1 %v3353_v15, %s2423_s6 }
 0x223   : > { %1641 = vrot.lane.b32.xlu1 %v3357_v25, %s2423_s6 }
 0x251   : > { %v2213_v43 = vpop.f32.mrf.mxu1 }
 0x252   : > { %v2201_v39 = vpop.f32.mrf.mxu0  ;;  %v1179_v21 = vadd.f32 %v2213_v43, %v3318_v10 }
 0x253   : > { %v1139_v45 = vadd.f32 %v2201_v39, %v3318_v10  ;;  %v1173_v61 = vpop.f32.mrf.mxu1 }
 0x254   : > { %v1133_v1 = vpop.f32.mrf.mxu0  ;;  %v1174_v50 = vadd.f32 %v3318_v10, %v1173_v61  ;;  %v1228_v54 = vmul.f32 %v3323_v9, %v1179_v21  ;;  %vm1206_vm10 = vcmp.gt.f32.partialorder %v1179_v21, 0.0 }
 0x255   : > { %vm1198_vm3 = vcmp.gt.f32.partialorder %v1139_v45, 0.0  ;;  %v1220_v38 = vmul.f32 %v3323_v9, %v1139_v45  ;;  %v1134_v49 = vadd.f32 %v3318_v10, %v1133_v1 }
 0x256   : > { %v1227_v2 = vmul.f32 %v3323_v9, %v1174_v50  ;;  %vm1205_vm6 = vcmp.gt.f32.partialorder %v1174_v50, 0.0  ;;  %v1244_v51 = vsel %vm1206_vm10, %v1179_v21, %v1228_v54  ;;  %vm1595_vm10 = vcmask 719872  }
 0x257   : > { %v1219_v16 = vmul.f32 %v3323_v9, %v1134_v49  ;;  %v3366_v17 = vsel %vm1198_vm3, %v1139_v45, %v1220_v38  ;;  %vm1197_vm4 = vcmp.gt.f32.partialorder %v1134_v49, 0.0  ;;  %v1415_v55 = vcombine.low %v1240_v46, %v1244_v51 }
 0x258   : > { %1631 = vrot.lane.b32.xlu0 %v3366_v17, %s2423_s6  ;;  %v3378_v37 = vsel %vm1205_vm6, %v1174_v50, %v1227_v2  ;;  %v1416_v42 = vcombine.high %v1240_v46, %v1244_v51  ;;  %v1383_v58 = vcombine.low %v3330_v44, %v3366_v17  ;;  %v3417_v45 = vsub.s32 %v1315_v0, %v1253_v29 }
 0x259   : > { %v3372_v52 = vsel %vm1197_vm4, %v1134_v49, %v1219_v16  ;;  %v1279_v24 = vcombine.low %v3339_v18, %v3378_v37  ;;  %v1423_v62 = vrot.slane %v1415_v55, %v3388_v40  ;;  %v1384_v23 = vcombine.high %v3330_v44, %v3366_v17 }
 0x25a   : > { %v1247_v33 = vcombine.low %v3335_v20, %v3372_v52  ;;  %v1391_v16 = vrot.slane %v1383_v58, %v3388_v40  ;;  %v1248_v58 = vcombine.high %v3335_v20, %v3372_v52  ;;  %vm1587_vm3 = vcmask 457728  }
 0x25b   : > { %v1287_v2 = vrot.slane %v1279_v24, %v3388_v40  ;;  %vm1589_vm4 = vcmask 523264   ;;  %vm1591_vm6 = vcmask 588800  }
 0x25c   : > { %1629 = vrot.lane.b32.xlu0 %v3372_v52, %s2423_s6 }
 0x260   : > { %1645 = vrot.lane.b32.xlu0 %v3378_v37, %s2423_s6 }
 0x264   : > { %1639 = vrot.lane.b32.xlu0 %v1240_v46, %s2423_s6  ;;  %v1255_v46 = vrot.slane %v1247_v33, %v3388_v40 }
 0x268   : > { %1647 = vrot.lane.b32.xlu0 %v1244_v51, %s2423_s6 }
 0x26d   : > { %v2216_v32 = vpop.f32.mrf.mxu1 }
 0x26e   : > { %v2204_v13 = vpop.f32.mrf.mxu0  ;;  %v1189_v63 = vadd.f32 %v2216_v32, %v3318_v10 }
 0x26f   : > { %v1149_v27 = vadd.f32 %v2204_v13, %v3318_v10  ;;  %v1183_v5 = vpop.f32.mrf.mxu1 }
 0x270   : > { %vm1208_vm13 = vcmp.gt.f32.partialorder %v1189_v63, 0.0  ;;  %v1230_v31 = vmul.f32 %v3323_v9, %v1189_v63  ;;  %v1143_v11 = vpop.f32.mrf.mxu0  ;;  %v1184_v57 = vadd.f32 %v3318_v10, %v1183_v5  ;;  %v1398_v5 = vrot.slane %v1384_v23, %v3388_v40 }
 0x271   : > { %vm1200_vm14 = vcmp.gt.f32.partialorder %v1149_v27, 0.0  ;;  %v1222_v28 = vmul.f32 %v3323_v9, %v1149_v27  ;;  %v1144_v3 = vadd.f32 %v3318_v10, %v1143_v11  ;;  %v3405_v10 = vrot.slane %v1416_v42, %v3388_v40 }
 0x272   : > { %v1246_v12 = vsel %vm1208_vm13, %v1189_v63, %v1230_v31  ;;  %vm1207_vm15 = vcmp.gt.f32.partialorder %v1184_v57, 0.0  ;;  %v1229_v36 = vmul.f32 %v3323_v9, %v1184_v57  ;;  %vm1599_vm13 = vcmask 850944  }
 0x273   : > { %v1431_v47 = vcombine.low %v1242_v6, %v1246_v12  ;;  %v1432_v19 = vcombine.high %v1242_v6, %v1246_v12  ;;  %vm1199_vm0 = vcmp.gt.f32.partialorder %v1144_v3, 0.0  ;;  %v1221_v48 = vmul.f32 %v3323_v9, %v1144_v3 }
 0x274   : > { %v1238_v14 = vsel %vm1200_vm14, %v1149_v27, %v1222_v28  ;;  %v3402_v22 = vsel %vm1207_vm15, %v1184_v57, %v1229_v36  ;;  %vm1601_vm14 = vcmask 916480   ;;  %vm1603_vm15 = vcmask 982016  }
 0x275   : > { %v1439_v26 = vrot.slane %v1431_v47, %v3388_v40  ;;  %v3409_v41 = vrot.slane %v1432_v19, %v3388_v40  ;;  %1635 = vrot.lane.b32.xlu1 %v1238_v14, %s2423_s6  ;;  %v1399_v9 = vcombine.low %v3347_v30, %v1238_v14  ;;  %v1237_v43 = vsel %vm1199_vm0, %v1144_v3, %v1221_v48 }
 0x276   : > { %v1295_v39 = vcombine.low %v3357_v25, %v3402_v22  ;;  %v1263_v7 = vcombine.low %v3353_v15, %v1237_v43  ;;  %v1400_v51 = vcombine.high %v3347_v30, %v1238_v14  ;;  %v1296_v11 = vcombine.high %v3357_v25, %v3402_v22 }
 0x277   : > { %v1479_v1 = vcombine.low %v1423_v62, %v1439_v26  ;;  %v1480_v61 = vcombine.high %v1423_v62, %v1439_v26  ;;  %v1495_v38 = vcombine.low %v3405_v10, %v3409_v41  ;;  %v1496_v49 = vcombine.high %v3405_v10, %v3409_v41 }
 0x278   : > { %v1407_v50 = vrot.slane %v1399_v9, %v3388_v40  ;;  %v1303_v4 = vrot.slane %v1295_v39, %v3388_v40  ;;  %v1271_v53 = vrot.slane %v1263_v7, %v3388_v40  ;;  %v1414_v32 = vrot.slane %v1400_v51, %v3388_v40 }
 0x279   : > { %1633 = vrot.lane.b32.xlu1 %v1237_v43, %s2423_s6  ;;  %v1487_v54 = vrot.slane %v1479_v1, %v3417_v45  ;;  %v1494_v63 = vrot.slane %v1480_v61, %v3417_v45  ;;  %v1503_v55 = vrot.slane %v1495_v38, %v3417_v45  ;;  %v1264_v57 = vcombine.high %v3353_v15, %v1237_v43 }
 0x27a   : > { %v1447_v21 = vcombine.low %v1391_v16, %v1407_v50  ;;  %v1343_v60 = vcombine.low %v1287_v2, %v1303_v4  ;;  %v1311_v59 = vcombine.low %v1255_v46, %v1271_v53  ;;  %v1448_v56 = vcombine.high %v1391_v16, %v1407_v50 }
 0x27b   : > { %v1463_v44 = vcombine.low %v1398_v5, %v1414_v32  ;;  %v1312_v42 = vcombine.high %v1255_v46, %v1271_v53  ;;  %v1344_v28 = vcombine.high %v1287_v2, %v1303_v4  ;;  %v1310_v36 = vrot.slane %v1296_v11, %v3388_v40  ;;  %v3493_v4 = vpop.permute.xlu0 %1623 }
 0x27c   : > { %v1455_v34 = vrot.slane %v1447_v21, %v3417_v45  ;;  %v3437_v29 = vrot.slane %v1311_v59, %v3417_v45  ;;  %v3440_v8 = vrot.slane %v1343_v60, %v3417_v45  ;;  %v1462_v30 = vrot.slane %v1448_v56, %v3417_v45 }
 0x27d   : > { %1649 = vrot.lane.b32.xlu1 %v3402_v22, %s2423_s6  ;;  %v1471_v0 = vrot.slane %v1463_v44, %v3417_v45  ;;  %v1278_v47 = vrot.slane %v1264_v57, %v3388_v40  ;;  %v1326_v15 = vrot.slane %v1312_v42, %v3417_v45  ;;  %v1358_v19 = vrot.slane %v1344_v28, %v3417_v45 }
 0x27e   : > { %v1511_v35 = vcombine.low %v1455_v34, %v1487_v54  ;;  %v1512_v13 = vcombine.high %v1455_v34, %v1487_v54  ;;  %v1375_v27 = vcombine.low %v3437_v29, %v3440_v8  ;;  %v1513_v17 = vcombine.low %v1462_v30, %v1494_v63 }
 0x27f   : > { %v1515_v31 = vcombine.low %v1471_v0, %v1503_v55  ;;  %v1516_v3 = vcombine.high %v1471_v0, %v1503_v55  ;;  %v1376_v25 = vcombine.high %v3437_v29, %v3440_v8  ;;  %v1262_v48 = vrot.slane %v1248_v58, %v3388_v40  ;;  %v3495_v21 = vpop.permute.xlu0 %1621 }
 0x280   : > { %1548 = vrot.lane.b32.xlu0 %v1511_v35, %s2426_s11  ;;  %v1378_v24 = vcombine.high %v1326_v15, %v1358_v19  ;;  %v1464_v1 = vcombine.high %v1398_v5, %v1414_v32  ;;  %v1510_v50 = vrot.slane %v1496_v49, %v3417_v45 }
 0x281   : > { %1643 = vrot.lane.b32.xlu1 %v1242_v6, %s2423_s6  ;;  %v1514_v6 = vcombine.high %v1462_v30, %v1494_v63  ;;  %v1328_v22 = vcombine.high %v1262_v48, %v1278_v47 }
 0x282   : > { %v1478_v16 = vrot.slane %v1464_v1, %v3417_v45 }
 0x283   : > { %v1342_v43 = vrot.slane %v1328_v22, %v3417_v45  ;;  %v3497_v54 = vpop.permute.xlu0 %1637 }
 0x284   : > { %1552 = vrot.lane.b32.xlu0 %v1512_v13, %s2427_s27  ;;  %v1517_v7 = vcombine.low %v1478_v16, %v1510_v50  ;;  %v1518_v2 = vcombine.high %v1478_v16, %v1510_v50 }
 0x285   : > { %1651 = vrot.lane.b32.xlu1 %v1246_v12, %s2423_s6  ;;  %v1280_v12 = vcombine.high %v3339_v18, %v3378_v37  ;;  %v1327_v18 = vcombine.low %v1262_v48, %v1278_v47  ;;  %v1377_v37 = vcombine.low %v1326_v15, %v1358_v19 }
 0x287   : > { %v1294_v20 = vrot.slane %v1280_v12, %v3388_v40  ;;  %v1335_v62 = vrot.slane %v1327_v18, %v3417_v45 }
 0x288   : > { %1556 = vrot.lane.b32.xlu0 %v1513_v17, %s2428_s24 }
 0x289   : > { %v1359_v52 = vcombine.low %v1294_v20, %v1310_v36  ;;  %v1360_v26 = vcombine.high %v1294_v20, %v1310_v36 }
 0x28b   : > { %v1367_v14 = vrot.slane %v1359_v52, %v3417_v45  ;;  %v1374_v39 = vrot.slane %v1360_v26, %v3417_v45 }
 0x28c   : > { %1560 = vrot.lane.b32.xlu0 %v1514_v6, %s2429_s9 }
 0x28d   : > { %v1379_v9 = vcombine.low %v1335_v62, %v1367_v14  ;;  %v1380_v33 = vcombine.high %v1335_v62, %v1367_v14  ;;  %v1381_v61 = vcombine.low %v1342_v43, %v1374_v39  ;;  %v1382_v38 = vcombine.high %v1342_v43, %v1374_v39  ;;  %v1628_v53 = vpop.permute.xlu1 %1627 }
 0x290   : > { %1564 = vrot.lane.b32.xlu0 %v1515_v31, %s2430_s12 }
 0x291   : > { %v3501_v41 = vpop.permute.xlu1 %1625 }
 0x294   : > { %1568 = vrot.lane.b32.xlu0 %v1516_v3, %s2431_s14 }
 0x295   : > { %v3505_v60 = vpop.permute.xlu1 %1641 }
 0x298   : > { %1520 = vrot.lane.b32.xlu0 %v1376_v25, %s2416_s10 }
 0x29c   : > { %1524 = vrot.lane.b32.xlu0 %v1377_v37, %s3742_s13  ;;  %s2433_s13 = smov 48  }
 0x2a0   : > { %1528 = vrot.lane.b32.xlu0 %v1378_v24, %s3744_s23  ;;  %s2435_s23 = smov 112  }
 0x2a4   : > { %1532 = vrot.lane.b32.xlu0 %v1379_v9, %s3743_s8  ;;  %s2434_s8 = smov 56  }
 0x2a8   : > { %1536 = vrot.lane.b32.xlu0 %v1380_v33, %s2432_s5 }
 0x2ac   : > { %1540 = vrot.lane.b32.xlu0 %v1381_v61, %s2433_s13 }
 0x2b0   : > { %1544 = vrot.lane.b32.xlu0 %v1382_v38, %s2434_s8 }
 0x2b4   : > { %1572 = vrot.lane.b32.xlu0 %v1517_v7, %s2435_s23 }
 0x2b8   : > { %1576 = vrot.lane.b32.xlu0 %v1518_v2, %s2423_s6 }
 0x2ca   : > { %v1632_v46 = vpop.permute.xlu0 %1631 }
 0x2cb   : > { %v1805_v31 = vcombine.low %v3493_v4, %v1632_v46  ;;  %v1806_v1 = vcombine.high %v3493_v4, %v1632_v46 }
 0x2cd   : > { %v1813_v36 = vrot.slane %v1805_v31, %v3388_v40  ;;  %v3577_v4 = vrot.slane %v1806_v1, %v3388_v40 }
 0x2ce   : > { %v3499_v10 = vpop.permute.xlu0 %1629 }
 0x2cf   : > { %v1669_v35 = vcombine.low %v3495_v21, %v3499_v10 }
 0x2d1   : > { %v3523_v5 = vrot.slane %v1669_v35, %v3388_v40 }
 0x2d2   : > { %v3503_v49 = vpop.permute.xlu0 %1645 }
 0x2d3   : > { %v1701_v23 = vcombine.low %v3497_v54, %v3503_v49 }
 0x2d5   : > { %v3526_v44 = vrot.slane %v1701_v23, %v3388_v40 }
 0x2d6   : > { %v1640_v59 = vpop.permute.xlu0 %1639 }
 0x2da   : > { %v1648_v32 = vpop.permute.xlu0 %1647 }
 0x2db   : > { %v1837_v42 = vcombine.low %v1640_v59, %v1648_v32  ;;  %v1838_v9 = vcombine.high %v1640_v59, %v1648_v32 }
 0x2dd   : > { %v1845_v15 = vrot.slane %v1837_v42, %v3388_v40  ;;  %v3567_v50 = vrot.slane %v1838_v9, %v3388_v40  ;;  %v1702_v42 = vcombine.high %v3497_v54, %v3503_v49 }
 0x2df   : > { %v1716_v54 = vrot.slane %v1702_v42, %v3388_v40 }
 0x2e7   : > { %v1636_v34 = vpop.permute.xlu1 %1635 }
 0x2e8   : > { %v1821_v17 = vcombine.low %v1628_v53, %v1636_v34  ;;  %v1822_v33 = vcombine.high %v1628_v53, %v1636_v34 }
 0x2ea   : > { %v1829_v28 = vrot.slane %v1821_v17, %v3388_v40  ;;  %v3570_v7 = vrot.slane %v1822_v33, %v3388_v40 }
 0x2eb   : > { %v3507_v51 = vpop.permute.xlu1 %1633 }
 0x2ec   : > { %v1685_v56 = vcombine.low %v3501_v41, %v3507_v51  ;;  %v1869_v19 = vcombine.low %v1813_v36, %v1829_v28  ;;  %v1870_v43 = vcombine.high %v1813_v36, %v1829_v28  ;;  %v1885_v59 = vcombine.low %v3577_v4, %v3570_v7 }
 0x2ed   : > { %v1686_v28 = vcombine.high %v3501_v41, %v3507_v51 }
 0x2ee   : > { %v3518_v30 = vrot.slane %v1685_v56, %v3388_v40  ;;  %v1877_v37 = vrot.slane %v1869_v19, %v3417_v45  ;;  %v1884_v2 = vrot.slane %v1870_v43, %v3417_v45  ;;  %v1893_v32 = vrot.slane %v1885_v59, %v3417_v45 }
 0x2ef   : > { %v3515_v13 = vpop.permute.xlu1 %1649  ;;  %v1700_v41 = vrot.slane %v1686_v28, %v3388_v40 }
 0x2f0   : > { %v1717_v63 = vcombine.low %v3505_v60, %v3515_v13  ;;  %v1733_v11 = vcombine.low %v3523_v5, %v3518_v30  ;;  %v1718_v31 = vcombine.high %v3505_v60, %v3515_v13 }
 0x2f2   : > { %v3529_v6 = vrot.slane %v1717_v63, %v3388_v40  ;;  %v3531_v0 = vpop.permute.xlu0 %1548  ;;  %v3546_v47 = vrot.slane %v1733_v11, %v3417_v45  ;;  %v1732_v60 = vrot.slane %v1718_v31, %v3388_v40 }
 0x2f3   : > { %v1644_v55 = vpop.permute.xlu1 %1643 }
 0x2f4   : > { %v1765_v57 = vcombine.low %v3526_v44, %v3529_v6  ;;  %v1766_v11 = vcombine.high %v3526_v44, %v3529_v6 }
 0x2f6   : > { %v3540_v3 = vrot.slane %v1765_v57, %v3417_v45  ;;  %v3542_v58 = vpop.permute.xlu0 %1552  ;;  %v1780_v13 = vrot.slane %v1766_v11, %v3417_v45 }
 0x2f7   : > { %v1652_v12 = vpop.permute.xlu1 %1651 }
 0x2f8   : > { %v1853_v25 = vcombine.low %v1644_v55, %v1652_v12  ;;  %v1797_v18 = vcombine.low %v3546_v47, %v3540_v3  ;;  %v1854_v14 = vcombine.high %v1644_v55, %v1652_v12  ;;  %v1734_v12 = vcombine.high %v3523_v5, %v3518_v30 }
 0x2f9   : > { %v1798_v44 = vcombine.high %v3546_v47, %v3540_v3  ;;  %v1781_v5 = vcombine.low %v1716_v54, %v1732_v60 }
 0x2fa   : > { %v1861_v48 = vrot.slane %v1853_v25, %v3388_v40  ;;  %v3550_v20 = vpop.permute.xlu0 %1556  ;;  %v3563_v61 = vrot.slane %v1854_v14, %v3388_v40  ;;  %v1670_v25 = vcombine.high %v3495_v21, %v3499_v10  ;;  %v1748_v49 = vrot.slane %v1734_v12, %v3417_v45 }
 0x2fc   : > { %v1901_v52 = vcombine.low %v1845_v15, %v1861_v48  ;;  %v1902_v22 = vcombine.high %v1845_v15, %v1861_v48  ;;  %v1917_v46 = vcombine.low %v3567_v50, %v3563_v61  ;;  %v1684_v30 = vrot.slane %v1670_v25, %v3388_v40 }
 0x2fd   : > { %v1799_v21 = vcombine.low %v1748_v49, %v1780_v13 }
 0x2fe   : > { %v1909_v24 = vrot.slane %v1901_v52, %v3417_v45  ;;  %v3556_v62 = vpop.permute.xlu0 %1560  ;;  %v1916_v38 = vrot.slane %v1902_v22, %v3417_v45  ;;  %v1925_v35 = vrot.slane %v1917_v46, %v3417_v45  ;;  %v1749_v6 = vcombine.low %v1684_v30, %v1700_v41 }
 0x2ff   : > { %v1789_v52 = vrot.slane %v1781_v5, %v3417_v45  ;;  %v1782_v22 = vcombine.high %v1716_v54, %v1732_v60  ;;  %v1750_v43 = vcombine.high %v1684_v30, %v1700_v41 }
 0x300   : > { %v1933_v26 = vcombine.low %v1877_v37, %v1909_v24  ;;  %v1934_v16 = vcombine.high %v1877_v37, %v1909_v24  ;;  %v1935_v34 = vcombine.low %v1884_v2, %v1916_v38  ;;  %v1936_v23 = vcombine.high %v1884_v2, %v1916_v38 }
 0x301   : > { %v1937_v17 = vcombine.low %v1893_v32, %v1925_v35  ;;  %v1938_v57 = vcombine.high %v1893_v32, %v1925_v35  ;;  %v1800_v37 = vcombine.high %v1748_v49, %v1780_v13  ;;  %v1757_v8 = vrot.slane %v1749_v6, %v3417_v45 }
 0x302   : > { %v3558_v39 = vpop.permute.xlu0 %1564  ;;  %1970 = vrot.lane.b32.xlu1 %v1933_v26, %s2426_s11  ;;  %s3768_s11 = smov 16  }
 0x303   : > { %v1801_v9 = vcombine.low %v1757_v8, %v1789_v52 }
 0x306   : > { %v3573_v53 = vpop.permute.xlu0 %1568  ;;  %1974 = vrot.lane.b32.xlu1 %v1934_v16, %s2427_s27  ;;  %s3770_s27 = smov 32  }
 0x30a   : > { %v1521_v56 = vpop.permute.xlu0 %1520  ;;  %1978 = vrot.lane.b32.xlu1 %v1935_v34, %s2428_s24 }
 0x30b   : > { %v1579_v10 = vsel %vm863_vm5, %v1375_v27, %v1521_v56  ;;  %v1918_v56 = vcombine.high %v3567_v50, %v3563_v61 }
 0x30e   : > { %v1525_v63 = vpop.permute.xlu0 %1524  ;;  %1982 = vrot.lane.b32.xlu1 %v1936_v23, %s2429_s9 }
 0x30f   : > { %v1580_v15 = vsel %vm897_vm7, %v1579_v10, %v1525_v63 }
 0x312   : > { %v1529_v55 = vpop.permute.xlu0 %1528  ;;  %1986 = vrot.lane.b32.xlu1 %v1937_v17, %s2430_s12  ;;  %s3771_s12 = sand.u32 1, %s2388_s16  }
 0x313   : > { %v1581_v48 = vsel %vm931_vm9, %v1580_v15, %v1529_v55 }
 0x316   : > { %v1533_v36 = vpop.permute.xlu0 %1532  ;;  %1990 = vrot.lane.b32.xlu1 %v1938_v57, %s2431_s14  ;;  %s2019_s14 = scalar_lea.sflag [#allocation4], %s3771_s12 }
 0x317   : > { %v1582_v40 = vsel %vm965_vm11, %v1581_v48, %v1533_v36 }
 0x31a   : > { %v1537_v51 = vpop.permute.xlu0 %1536  ;;  %1942 = vrot.lane.b32.xlu1 %v1798_v44, %s2416_s10  ;;  %s3769_s10 = smov 24  }
 0x31b   : > { %v1584_v29 = vsel %vm1583_vm1, %v1582_v40, %v1537_v51 }
 0x31e   : > { %v1541_v19 = vpop.permute.xlu0 %1540  ;;  %1946 = vrot.lane.b32.xlu1 %v1799_v21, %s3768_s11  ;;  %s2436_s11 = smov [#allocation3]  }
 0x31f   : > { %v1586_v27 = vsel %vm1585_vm2, %v1584_v29, %v1541_v19 }
 0x322   : > { %v1545_v24 = vpop.permute.xlu0 %1544  ;;  %1950 = vrot.lane.b32.xlu1 %v1800_v37, %s3769_s10  ;;  %s2324_s10 = sshll.u32 %s2436_s11, 4  ;;  %s2325_s10 = int_to_ptr.vmem [resolvable:$false] %s2324_s10 }
 0x323   : > { %v1588_v14 = vsel %vm1587_vm3, %v1586_v27, %v1545_v24 }
 0x324   : > { %v1590_v26 = vsel %vm1589_vm4, %v1588_v14, %v3531_v0  ;;  %v1796_v0 = vrot.slane %v1782_v22, %v3417_v45 }
 0x325   : > { %v1592_v33 = vsel %vm1591_vm6, %v1590_v26, %v3542_v58  ;;  %v1802_v58 = vcombine.high %v1757_v8, %v1789_v52 }
 0x326   : > { %v1594_v1 = vsel %vm1593_vm8, %v1592_v33, %v3550_v20  ;;  %v1573_v38 = vpop.permute.xlu0 %1572  ;;  %1954 = vrot.lane.b32.xlu1 %v1801_v9, %s3770_s27  ;;  %v1764_v20 = vrot.slane %v1750_v43, %v3417_v45  ;;  %s2326_s27 = scalar_lea.vmem %s2325_s10, 512 }
 0x327   : > { %v1596_v16 = vsel %vm1595_vm10, %v1594_v1, %v3556_v62 }
 0x328   : > { %v1598_v2 = vsel %vm1597_vm12, %v1596_v16, %v3558_v39  ;;  %v1803_v35 = vcombine.low %v1764_v20, %v1796_v0  ;;  %v1886_v39 = vcombine.high %v3577_v4, %v3570_v7  ;;  %v1804_v23 = vcombine.high %v1764_v20, %v1796_v0 }
 0x329   : > { %v1600_v46 = vsel %vm1599_vm13, %v1598_v2, %v3573_v53  ;;  %v1932_v53 = vrot.slane %v1918_v56, %v3417_v45 }
 0x32a   : > { %v1602_v34 = vsel %vm1601_vm14, %v1600_v46, %v1573_v38  ;;  %v1577_v59 = vpop.permute.xlu0 %1576  ;;  %1958 = vrot.lane.b32.xlu1 %v1802_v58, %s2432_s5  ;;  %v1900_v32 = vrot.slane %v1886_v39, %v3417_v45 }
 0x32b   : > { %v1604_v62 = vsel %vm1603_vm15, %v1602_v34, %v1577_v59 }
 0x32c   : > { %2016 = vst [vmem:[%s2613_s30] sm:$0xff] %v1604_v62  ;;  %v1939_v63 = vcombine.low %v1900_v32, %v1932_v53  ;;  %v1940_v17 = vcombine.high %v1900_v32, %v1932_v53 }
 0x32e   : > { %1962 = vrot.lane.b32.xlu1 %v1803_v35, %s2433_s13  ;;  %s2155_s13 = sshll.u32 %s2400_s19, 2  ;;  %s2035_s19 = sshll.u32 %s2613_s30, 4  ;;  %s2036_s19 = int_to_ptr.vmem [resolvable:$true] %s2035_s19 }
 0x32f   : > { %s2320_s5 = scalar_lea.vmem %s2036_s19, 256  ;;  %p2327_p5 = scmp.lt.s32.totalorder %s2036_s19, %s2325_s10 }
 0x330   : > { %p2321_p1 = scmp.ne.s32.totalorder %s2036_s19, %s2320_s5  ;;  %p2328_p6 = scmp.lt.s32.totalorder %s2326_s27, %s2320_s5 }
 0x332   : > { %1966 = vrot.lane.b32.xlu1 %v1804_v23, %s2434_s8  ;;  %s2154_s8 = sshll.u32 %s2396_s18, 1  ;;  %p2322_p2 = pnand %p2321_p1, %p2513_p3 }
 0x333   : > { %p2329_p7 = por %p2328_p6, %p2327_p5 }
 0x334   : > { %p2323_p4 = pneg %p2322_p2 }
 0x336   : > { %1994 = vrot.lane.b32.xlu1 %v1939_v63, %s2435_s23  ;;  %s2031_s23 = sadd.s32 %s2155_s13, %s2154_s8  ;;  %p2330_p9 = pnand %p2329_p7, %p2323_p4 }
 0x337   : > { %s2156_s18 = sshll.u32 %s2031_s23, 7 }
 0x338   : > { %s3676_s9 = scalar_lea.hbm %s3730_s4, %s2156_s18 }
 0x33a   : > { %1998 = vrot.lane.b32.xlu1 %v1940_v17, %s2423_s6 }
 0x374   : > { %v1971_v61 = vpop.permute.xlu1 %1970 }
 0x378   : > { %v1975_v50 = vpop.permute.xlu1 %1974 }
 0x37c   : > { %v1979_v55 = vpop.permute.xlu1 %1978 }
 0x380   : > { %v1983_v7 = vpop.permute.xlu1 %1982 }
 0x384   : > { %v1987_v4 = vpop.permute.xlu1 %1986 }
 0x388   : > { %v1991_v31 = vpop.permute.xlu1 %1990 }
 0x38c   : > { %v1943_v11 = vpop.permute.xlu1 %1942 }
 0x38d   : > { %v2001_v12 = vsel %vm863_vm5, %v1797_v18, %v1943_v11 }
 0x390   : > { %v1947_v57 = vpop.permute.xlu1 %1946 }
 0x391   : > { %v2002_v36 = vsel %vm897_vm7, %v2001_v12, %v1947_v57 }
 0x394   : > { %v1951_v42 = vpop.permute.xlu1 %1950 }
 0x395   : > { %v2003_v60 = vsel %vm931_vm9, %v2002_v36, %v1951_v42 }
 0x398   : > { %v1955_v45 = vpop.permute.xlu1 %1954 }
 0x399   : > { %v2004_v13 = vsel %vm965_vm11, %v2003_v60, %v1955_v45 }
 0x39c   : > { %v1959_v28 = vpop.permute.xlu1 %1958 }
 0x39d   : > { %v2005_v44 = vsel %vm1583_vm1, %v2004_v13, %v1959_v28 }
 0x3a0   : > { %v1963_v25 = vpop.permute.xlu1 %1962 }
 0x3a1   : > { %v2006_v54 = vsel %vm1585_vm2, %v2005_v44, %v1963_v25 }
 0x3a4   : > { %v1967_v41 = vpop.permute.xlu1 %1966 }
 0x3a5   : > { %v2007_v49 = vsel %vm1587_vm3, %v2006_v54, %v1967_v41 }
 0x3a6   : > { %v2008_v3 = vsel %vm1589_vm4, %v2007_v49, %v1971_v61 }
 0x3a7   : > { %v2009_v47 = vsel %vm1591_vm6, %v2008_v3, %v1975_v50 }
 0x3a8   : > { %v2010_v18 = vsel %vm1593_vm8, %v2009_v47, %v1979_v55  ;;  %v1995_v51 = vpop.permute.xlu1 %1994 }
 0x3a9   : > { %v2011_v30 = vsel %vm1595_vm10, %v2010_v18, %v1983_v7 }
 0x3aa   : > { %v2012_v5 = vsel %vm1597_vm12, %v2011_v30, %v1987_v4 }
 0x3ab   : > { %v2013_v21 = vsel %vm1599_vm13, %v2012_v5, %v1991_v31 }
 0x3ac   : > { %v2014_v10 = vsel %vm1601_vm14, %v2013_v21, %v1995_v51  ;;  %v1999_v6 = vpop.permute.xlu1 %1998 }
 0x3ad   : > { %v2015_v15 = vsel %vm1603_vm15, %v2014_v10, %v1999_v6 }
 0x3ae   : > { %2017 = vst [vmem:[%s2613_s30 + $0x8] sm:$0xff] %v2015_v15 }
 0x3af   : > { %2333 = shalt.err (!%p2330_p9)
}
 0x3b0   : > { %s2334_s30 = scalar_lea.hbm %s3676_s9, 256  ;;  %s2338_s23 = scalar_lea.hbm %s3730_s4, 1024 }
 0x3b1   : > { %p2335_p10 = scmp.ne.s32.totalorder %s3676_s9, %s2334_s30  ;;  %p2339_p13 = scmp.lt.s32.totalorder %s3676_s9, %s3730_s4 }
 0x3b2   : > { %p2340_p0 = scmp.lt.s32.totalorder %s2338_s23, %s2334_s30 }
 0x3b3   : > { %p2336_p11 = pnand %p2335_p10, %p2513_p3 }
 0x3b4   : > { %p2341_p1 = por %p2340_p0, %p2339_p13 }
 0x3b5   : > { %p2337_p12 = pneg %p2336_p11 }
 0x3b7   : > { %p2342_p2 = pnand %p2341_p1, %p2337_p12 }
 0x3b9   : > { %2345 = shalt.err (!%p2342_p2)
}
 0x3ba   : > { %2227 = dma.vmem_to_hbm [thread:$0]  (%p2513_p3), %s2036_s19, 256, %s3676_s9, %s2019_s14  }
 0x3bb PF: > { %p2233_p4 = scmp.ge.s32.totalorder %s2412_s22, 2  ;;  %s2047_s24 = sand.u32 1, %s2384_s15  }
 0x3bc   : > { %s2048_s12 = scalar_lea.sflag [#allocation4], %s2047_s24 }
 0x3bd   : > { %p2230_p5 = pnand %p2233_p4, %p2522_p8 }
 0x3bf   : > { %p2231_p6 = pneg %p2230_p5 }
 0x3c1   : > { %2379 = dma.done.wait (%p2231_p6), %s2048_s12, 256  }
 0x3c2   : > { %2381 = vsyncadd (%p2231_p6), %s2048_s12, 4294967040  ;;  %s17_s22 = sadd.s32 1, %s2412_s22   ;;  %s3772_s15 = smov %s2388_s16 }
 0x3c3   : > { %p14_p7 = scmp.ge.s32.totalorder %s17_s22, 6   ;;  %s3773_s16 = smov %s2392_s17 }
 0x3c4   : > { %s3774_s17 = smov %s2531_s7  ;;  %s3775_s18 = smov %s2404_s20 }
 0x3c5   : > { %s3776_s19 = smov %s2408_s21  ;;  %s3777_s20 = smov %s3780_s25 }
 0x3c6   : > { %s3778_s21 = smov %s3784_s26  ;;  %16 = sbr.rel (!%p14_p7) target bundleno = 5 (0x5), region = 84 }
 0x3cb   :  { %2053 = vsyncpa [#allocation4], 1 }
 0x3cc   :  { %2055 = vsyncpa [#allocation4 + $0x1], 1 }

</bundles_post_ra>
